<compile_context>
chip_gen: v6e
topology: v6e:2x2x1
jax: 0.10.0
libtpu: 0.0.40
codegen_flags: <defaults>
</compile_context>

<pallas_src>
import jax
import jax.numpy as jnp
from jax.experimental import pallas as pl

# ----- small, Phi3-shaped config -------------------------------------------
BATCH = 2
SEQ = 8
HIDDEN = 64
NUM_HEADS = 4
NUM_KV_HEADS = 4                    # Phi3-mini uses n_kv == n_heads
HEAD_DIM = HIDDEN // NUM_HEADS      # 16
INTERMEDIATE = 128
RMS_EPS = 1e-5
ROPE_BASE = 10000.0
NEG_INF = -1e9


def _rms_norm(x, w):
    var = jnp.mean(x * x, axis=-1, keepdims=True)
    return (x * jax.lax.rsqrt(var + RMS_EPS)) * w


# ----- Pallas kernel: whole layer, single invocation -------------------------
def phi3_decoder_kernel(x_ref, bias_ref, cos_ref, sin_ref,
                        ln1_ref, wq_ref, wqr_ref, wk_ref, wkr_ref, wv_ref,
                        wo_ref, ln2_ref, wgu_ref, wd_ref, o_ref):
    f32 = jnp.float32
    bf16 = jnp.bfloat16
    bs, hid = x_ref.shape            # (B*S, H)
    nh = wq_ref.shape[0]             # heads
    inter = wd_ref.shape[0]          # MLP intermediate size

    x = x_ref[...]                   # (BS, H) f32
    residual = x

    # ---- input RMSNorm (f32) ----
    h = _rms_norm(x, ln1_ref[...]).astype(bf16)
    # Broadcast along a new leading (major) head dim — cheap, no lane movement.
    h3 = jnp.broadcast_to(h, (nh, bs, hid))                      # (NH, BS, H) bf16

    def proj(w_ref):                 # head-batched projection, f32 accumulation
        return jnp.einsum('nsh,nhd->nsd', h3, w_ref[...],
                          preferred_element_type=f32)            # (NH, BS, HD)

    # ---- RoPE via pre-rotated weight copies (no slices / rolls in-kernel) ----
    cos = cos_ref[...]               # (BS, HD), broadcasts over heads
    sin = sin_ref[...]
    q = proj(wq_ref) * cos + proj(wqr_ref) * sin   # scale already folded into Wq
    k = proj(wk_ref) * cos + proj(wkr_ref) * sin
    v = proj(wv_ref)

    qb = q.astype(bf16)
    kb = k.astype(bf16)
    vb = v.astype(bf16)

    # ---- attention: batched over heads; batch separation + causal + padding
    #      handled by the (BS, BS) block-diagonal additive bias ----
    s = jnp.einsum('nsd,ntd->nst', qb, kb, preferred_element_type=f32)
    s = s + bias_ref[...]                                       # (NH, BS, BS)
    m = jnp.max(s, axis=-1, keepdims=True)
    p = jnp.exp(s - m)
    l = jnp.sum(p, axis=-1, keepdims=True)
    p = p * pl.reciprocal(l, approx=True)                       # EUP, frees VALU

    ctx = jnp.einsum('nst,ntd->nsd', p.astype(bf16), vb,
                     preferred_element_type=f32)                # (NH, BS, HD)

    # ---- output projection: per-head (HD, H) weights, then sum over heads
    #      (reduction over a major dim == plain vector adds) ----
    oh = jnp.einsum('nsd,ndh->nsh', ctx.astype(bf16), wo_ref[...],
                    preferred_element_type=f32)                 # (NH, BS, H)
    attn_out = jnp.sum(oh, axis=0)                              # (BS, H) f32

    # ---- residual + post-attention RMSNorm ----
    h = residual + attn_out
    residual = h
    h2 = _rms_norm(h, ln2_ref[...]).astype(bf16)

    # ---- Phi3 MLP: fused gate_up_proj (split at the 128-lane boundary) ----
    gu = jnp.dot(h2, wgu_ref[...], preferred_element_type=f32)  # (BS, 2I)
    gate = gu[:, :inter]
    up = gu[:, inter:]
    act = up * (gate * jax.nn.sigmoid(gate))                    # f32 element-wise
    mlp = jnp.dot(act.astype(bf16), wd_ref[...],
                  preferred_element_type=f32)                   # (BS, H)

    o_ref[...] = residual + mlp


# ----- wrapper-side (one-time) weight re-layout ------------------------------
def _prep_params(params):
    """Split fused qkv per head (lane-0 aligned), fold the attention scale into
    Wq, fold rotate_half into column-permuted copies of Wq/Wk, reshape Wo per
    head, and cast matmul weights to bf16 (norm weights stay f32)."""
    q_sz = NUM_HEADS * HEAD_DIM
    kv_sz = NUM_KV_HEADS * HEAD_DIM
    half = HEAD_DIM // 2
    scale = 1.0 / (HEAD_DIM ** 0.5)
    group = NUM_HEADS // NUM_KV_HEADS

    wqkv = params["wqkv"]
    wq = wqkv[:, :q_sz].reshape(HIDDEN, NUM_HEADS, HEAD_DIM).transpose(1, 0, 2)
    wk = wqkv[:, q_sz:q_sz + kv_sz].reshape(
        HIDDEN, NUM_KV_HEADS, HEAD_DIM).transpose(1, 0, 2)
    wv = wqkv[:, q_sz + kv_sz:].reshape(
        HIDDEN, NUM_KV_HEADS, HEAD_DIM).transpose(1, 0, 2)
    if group > 1:   # GQA: replicate kv-head weights per query head (no-op here)
        wk = jnp.repeat(wk, group, axis=0)
        wv = jnp.repeat(wv, group, axis=0)

    def rot_cols(w):   # rotate_half as a column permutation/negation of W
        return jnp.concatenate([-w[..., half:], w[..., :half]], axis=-1)

    wq_rot = rot_cols(wq) * scale
    wq = wq * scale                          # fold 1/sqrt(HEAD_DIM) into Q proj
    wk_rot = rot_cols(wk)

    bf = jnp.bfloat16
    return dict(
        ln1=params["ln1"].astype(jnp.float32),
        ln2=params["ln2"].astype(jnp.float32),
        wq=wq.astype(bf), wq_rot=wq_rot.astype(bf),
        wk=wk.astype(bf), wk_rot=wk_rot.astype(bf),
        wv=wv.astype(bf),
        wo=params["wo"].reshape(NUM_HEADS, HEAD_DIM, HIDDEN).astype(bf),
        wgu=params["wgu"].astype(bf),
        wd=params["wd"].astype(bf),
    )


def phi3_decoder_layer(hidden_states, block_bias, cos, sin, prepped):
    B, S, H = hidden_states.shape
    BS = B * S
    x2d = hidden_states.reshape(BS, H).astype(jnp.float32)
    # Single invocation, no grid: every operand fits VMEM comfortably at this
    # size, so one block avoids per-grid-step pipeline overhead entirely.
    # TODO(synk): on v7x (2 TensorCores) a grid=(B,) split with
    # dimension_semantics=("parallel",) only pays off once per-core work is
    # large enough; at real Phi3 sizes re-tile with a K/N reduction grid axis.
    out2d = pl.pallas_call(
        phi3_decoder_kernel,
        out_shape=jax.ShapeDtypeStruct((BS, H), jnp.float32),
    )(x2d, block_bias,
      cos.reshape(BS, HEAD_DIM), sin.reshape(BS, HEAD_DIM),
      prepped["ln1"], prepped["wq"], prepped["wq_rot"],
      prepped["wk"], prepped["wk_rot"], prepped["wv"],
      prepped["wo"], prepped["ln2"], prepped["wgu"], prepped["wd"])
    return out2d.reshape(B, S, H)


def _rotary(position_ids):
    inv_freq = 1.0 / (ROPE_BASE ** (
        jnp.arange(0, HEAD_DIM, 2, dtype=jnp.float32) / HEAD_DIM))
    freqs = position_ids.astype(jnp.float32)[..., None] * inv_freq[None, None, :]
    emb = jnp.concatenate([freqs, freqs], axis=-1)          # (B, S, HEAD_DIM)
    return jnp.cos(emb), jnp.sin(emb)


def _build_block_bias(attention_mask):
    """(B*S, B*S) additive bias: block-diagonal over batches + causal + padding.
    At real sizes this would be generated in-kernel from broadcasted_iota to
    avoid O(B*S^2) HBM traffic; at 16x16 it is a 1 KiB constant."""
    B, S = attention_mask.shape
    BS = B * S
    idx = jnp.arange(BS)
    b_id, pos = idx // S, idx % S
    same_batch = b_id[:, None] == b_id[None, :]
    causal = pos[:, None] >= pos[None, :]
    pad = attention_mask.reshape(BS).astype(bool)[None, :]
    keep = same_batch & causal & pad
    return jnp.where(keep, 0.0, NEG_INF).astype(jnp.float32)


def _build_attn_bias(attention_mask):
    """(B, S, S) additive mask — used only by the pure-JAX reference."""
    B, S = attention_mask.shape
    causal = jnp.tril(jnp.ones((S, S), dtype=bool))
    pad = attention_mask.astype(bool)[:, None, :]
    keep = causal[None, :, :] & pad
    return jnp.where(keep, 0.0, NEG_INF).astype(jnp.float32)


def phi3_decoder_layer_pipe(inputs, params):
    """Mirrors Phi3DecoderLayerPipe.forward: (h, mask, pos, labels) -> same tuple."""
    hidden_states, attention_mask, position_ids, labels = inputs
    # TODO(synk): mlp_offloaded_to_cpu / register_hook / move_data_to_device is
    # host-offload device-placement plumbing with no Pallas equivalent.
    cos, sin = _rotary(position_ids)
    bias = _build_block_bias(attention_mask)
    prepped = _prep_params(params)   # one-time weight re-layout (cache in real use)
    out = phi3_decoder_layer(hidden_states, bias, cos, sin, prepped)
    return (out, attention_mask, position_ids, labels)


# ----- pure-JAX f32 reference (correctness check) ----------------------------
def reference(hidden_states, bias, cos, sin, p):
    def rms(x, w):
        var = jnp.mean(x * x, axis=-1, keepdims=True)
        return x * jax.lax.rsqrt(var + RMS_EPS) * w

    B, S, _ = hidden_states.shape
    res = hidden_states
    h = rms(hidden_states, p["ln1"])
    qkv = h @ p["wqkv"]
    q_sz = NUM_HEADS * HEAD_DIM
    kv_sz = NUM_KV_HEADS * HEAD_DIM
    q = qkv[..., :q_sz].reshape(B, S, NUM_HEADS, HEAD_DIM)
    k = qkv[..., q_sz:q_sz + kv_sz].reshape(B, S, NUM_KV_HEADS, HEAD_DIM)
    v = qkv[..., q_sz + kv_sz:].reshape(B, S, NUM_KV_HEADS, HEAD_DIM)

    def rope(t):
        half = HEAD_DIM // 2
        rot = jnp.concatenate([-t[..., half:], t[..., :half]], axis=-1)
        return t * cos[:, :, None, :] + rot * sin[:, :, None, :]

    q, k = rope(q), rope(k)
    scores = jnp.einsum('bqhd,bkhd->bhqk', q, k) / (HEAD_DIM ** 0.5)
    scores = scores + bias[:, None, :, :]
    pattn = jax.nn.softmax(scores, axis=-1)
    o = jnp.einsum('bhqk,bkhd->bqhd', pattn, v).reshape(B, S, NUM_HEADS * HEAD_DIM)
    h = res + o @ p["wo"]
    res = h
    gu = rms(h, p["ln2"]) @ p["wgu"]
    gate, up = gu[..., :INTERMEDIATE], gu[..., INTERMEDIATE:]
    return res + (up * jax.nn.silu(gate)) @ p["wd"]


if __name__ == "__main__":
    key = jax.random.PRNGKey(0)
    ks = jax.random.split(key, 8)
    op_size = (NUM_HEADS + 2 * NUM_KV_HEADS) * HEAD_DIM
    params = {
        "ln1": 1.0 + 0.1 * jax.random.normal(ks[0], (1, HIDDEN), jnp.float32),
        "wqkv": 0.05 * jax.random.normal(ks[1], (HIDDEN, op_size), jnp.float32),
        "wo": 0.05 * jax.random.normal(ks[2], (NUM_HEADS * HEAD_DIM, HIDDEN), jnp.float32),
        "ln2": 1.0 + 0.1 * jax.random.normal(ks[3], (1, HIDDEN), jnp.float32),
        "wgu": 0.05 * jax.random.normal(ks[4], (HIDDEN, 2 * INTERMEDIATE), jnp.float32),
        "wd": 0.05 * jax.random.normal(ks[5], (INTERMEDIATE, HIDDEN), jnp.float32),
    }

    hidden_states = jax.random.normal(ks[6], (BATCH, SEQ, HIDDEN), jnp.float32)
    attention_mask = jnp.ones((BATCH, SEQ), jnp.int32)
    position_ids = jnp.broadcast_to(
        jnp.arange(SEQ, dtype=jnp.int32)[None, :], (BATCH, SEQ))
    labels = jax.random.randint(ks[7], (BATCH, SEQ), 0, 1000)

    out, am, pid, lab = phi3_decoder_layer_pipe(
        (hidden_states, attention_mask, position_ids, labels), params)
    out = jax.block_until_ready(out)

    ref = reference(hidden_states, _build_attn_bias(attention_mask),
                    *_rotary(position_ids), params)
    assert out.shape == (BATCH, SEQ, HIDDEN)
    # Tolerance accounts for bf16 MXU inputs + approx softmax reciprocal.
    assert jnp.allclose(out, ref, atol=3e-2, rtol=3e-2), \
        float(jnp.max(jnp.abs(out - ref)))
    print("KERNEL_OK")
</pallas_src>

<mosaic_0001>
module attributes {stable_mosaic.version = 11 : i64} {
  func.func @phi3_decoder_kernel(%arg0: memref<16x64xf32, #tpu.memory_space<vmem>>, %arg1: memref<16x16xf32, #tpu.memory_space<vmem>>, %arg2: memref<16x16xf32, #tpu.memory_space<vmem>>, %arg3: memref<16x16xf32, #tpu.memory_space<vmem>>, %arg4: memref<1x64xf32, #tpu.memory_space<vmem>>, %arg5: memref<4x64x16xbf16, #tpu.memory_space<vmem>>, %arg6: memref<4x64x16xbf16, #tpu.memory_space<vmem>>, %arg7: memref<4x64x16xbf16, #tpu.memory_space<vmem>>, %arg8: memref<4x64x16xbf16, #tpu.memory_space<vmem>>, %arg9: memref<4x64x16xbf16, #tpu.memory_space<vmem>>, %arg10: memref<4x16x64xbf16, #tpu.memory_space<vmem>>, %arg11: memref<1x64xf32, #tpu.memory_space<vmem>>, %arg12: memref<64x256xbf16, #tpu.memory_space<vmem>>, %arg13: memref<128x64xbf16, #tpu.memory_space<vmem>>, %arg14: memref<16x64xf32, #tpu.memory_space<vmem>>) attributes {dimension_semantics = [], scalar_prefetch = 0 : i64, scratch_operands = 0 : i64, tpu.core_type = #tpu.core_type<tc>} {
    %c0 = arith.constant 0 : index
    %c0_0 = arith.constant 0 : index
    %0 = vector.load %arg0[%c0, %c0_0] : memref<16x64xf32, #tpu.memory_space<vmem>>, vector<16x64xf32>
    %c0_1 = arith.constant 0 : index
    %c0_2 = arith.constant 0 : index
    %1 = vector.load %arg4[%c0_1, %c0_2] : memref<1x64xf32, #tpu.memory_space<vmem>>, vector<1x64xf32>
    %2 = arith.mulf %0, %0 : vector<16x64xf32>
    %cst = arith.constant dense<0.000000e+00> : vector<16xf32>
    %3 = vector.multi_reduction <add>, %2, %cst [1] : vector<16x64xf32> to vector<16xf32>
    %4 = vector.shape_cast %3 : vector<16xf32> to vector<16x1xf32>
    %cst_3 = arith.constant 6.400000e+01 : f32
    %5 = vector.broadcast %cst_3 : f32 to vector<16x1xf32>
    %6 = arith.divf %4, %5 : vector<16x1xf32>
    %cst_4 = arith.constant 9.99999974E-6 : f32
    %7 = vector.broadcast %cst_4 : f32 to vector<16x1xf32>
    %8 = arith.addf %6, %7 : vector<16x1xf32>
    %9 = math.rsqrt %8 : vector<16x1xf32>
    %10 = vector.broadcast %9 : vector<16x1xf32> to vector<16x64xf32>
    %11 = arith.mulf %0, %10 : vector<16x64xf32>
    %12 = vector.broadcast %1 : vector<1x64xf32> to vector<16x64xf32>
    %13 = arith.mulf %11, %12 : vector<16x64xf32>
    %14 = arith.truncf %13 : vector<16x64xf32> to vector<16x64xbf16>
    %15 = vector.shape_cast %14 : vector<16x64xbf16> to vector<1x16x64xbf16>
    %16 = vector.broadcast %15 : vector<1x16x64xbf16> to vector<4x16x64xbf16>
    %c0_5 = arith.constant 0 : index
    %c0_6 = arith.constant 0 : index
    %17 = vector.load %arg2[%c0_5, %c0_6] : memref<16x16xf32, #tpu.memory_space<vmem>>, vector<16x16xf32>
    %c0_7 = arith.constant 0 : index
    %c0_8 = arith.constant 0 : index
    %18 = vector.load %arg3[%c0_7, %c0_8] : memref<16x16xf32, #tpu.memory_space<vmem>>, vector<16x16xf32>
    %c0_9 = arith.constant 0 : index
    %c0_10 = arith.constant 0 : index
    %c0_11 = arith.constant 0 : index
    %19 = vector.load %arg5[%c0_9, %c0_10, %c0_11] : memref<4x64x16xbf16, #tpu.memory_space<vmem>>, vector<4x64x16xbf16>
    "tpu.trace_start"() <{level = 10 : i32, message = "nsh,nhd->nsd"}> : () -> ()
    %cst_12 = arith.constant dense<0.000000e+00> : vector<4x16x16xf32>
    %20 = tpu.matmul %16, %19, %cst_12 {dimension_numbers = #tpu.dot_dimension_numbers<[2], [1], [1], [2], [0, 0, 0, 1, 1, 2], [0], [0]>} : vector<4x16x64xbf16>, vector<4x64x16xbf16>, vector<4x16x16xf32> -> vector<4x16x16xf32>
    "tpu.trace_stop"() : () -> ()
    %21 = vector.shape_cast %17 : vector<16x16xf32> to vector<1x16x16xf32>
    %22 = vector.broadcast %21 : vector<1x16x16xf32> to vector<4x16x16xf32>
    %23 = arith.mulf %20, %22 : vector<4x16x16xf32>
    %c0_13 = arith.constant 0 : index
    %c0_14 = arith.constant 0 : index
    %c0_15 = arith.constant 0 : index
    %24 = vector.load %arg6[%c0_13, %c0_14, %c0_15] : memref<4x64x16xbf16, #tpu.memory_space<vmem>>, vector<4x64x16xbf16>
    "tpu.trace_start"() <{level = 10 : i32, message = "nsh,nhd->nsd"}> : () -> ()
    %cst_16 = arith.constant dense<0.000000e+00> : vector<4x16x16xf32>
    %25 = tpu.matmul %16, %24, %cst_16 {dimension_numbers = #tpu.dot_dimension_numbers<[2], [1], [1], [2], [0, 0, 0, 1, 1, 2], [0], [0]>} : vector<4x16x64xbf16>, vector<4x64x16xbf16>, vector<4x16x16xf32> -> vector<4x16x16xf32>
    "tpu.trace_stop"() : () -> ()
    %26 = vector.shape_cast %18 : vector<16x16xf32> to vector<1x16x16xf32>
    %27 = vector.broadcast %26 : vector<1x16x16xf32> to vector<4x16x16xf32>
    %28 = arith.mulf %25, %27 : vector<4x16x16xf32>
    %29 = arith.addf %23, %28 : vector<4x16x16xf32>
    %c0_17 = arith.constant 0 : index
    %c0_18 = arith.constant 0 : index
    %c0_19 = arith.constant 0 : index
    %30 = vector.load %arg7[%c0_17, %c0_18, %c0_19] : memref<4x64x16xbf16, #tpu.memory_space<vmem>>, vector<4x64x16xbf16>
    "tpu.trace_start"() <{level = 10 : i32, message = "nsh,nhd->nsd"}> : () -> ()
    %cst_20 = arith.constant dense<0.000000e+00> : vector<4x16x16xf32>
    %31 = tpu.matmul %16, %30, %cst_20 {dimension_numbers = #tpu.dot_dimension_numbers<[2], [1], [1], [2], [0, 0, 0, 1, 1, 2], [0], [0]>} : vector<4x16x64xbf16>, vector<4x64x16xbf16>, vector<4x16x16xf32> -> vector<4x16x16xf32>
    "tpu.trace_stop"() : () -> ()
    %32 = vector.shape_cast %17 : vector<16x16xf32> to vector<1x16x16xf32>
    %33 = vector.broadcast %32 : vector<1x16x16xf32> to vector<4x16x16xf32>
    %34 = arith.mulf %31, %33 : vector<4x16x16xf32>
    %c0_21 = arith.constant 0 : index
    %c0_22 = arith.constant 0 : index
    %c0_23 = arith.constant 0 : index
    %35 = vector.load %arg8[%c0_21, %c0_22, %c0_23] : memref<4x64x16xbf16, #tpu.memory_space<vmem>>, vector<4x64x16xbf16>
    "tpu.trace_start"() <{level = 10 : i32, message = "nsh,nhd->nsd"}> : () -> ()
    %cst_24 = arith.constant dense<0.000000e+00> : vector<4x16x16xf32>
    %36 = tpu.matmul %16, %35, %cst_24 {dimension_numbers = #tpu.dot_dimension_numbers<[2], [1], [1], [2], [0, 0, 0, 1, 1, 2], [0], [0]>} : vector<4x16x64xbf16>, vector<4x64x16xbf16>, vector<4x16x16xf32> -> vector<4x16x16xf32>
    "tpu.trace_stop"() : () -> ()
    %37 = vector.shape_cast %18 : vector<16x16xf32> to vector<1x16x16xf32>
    %38 = vector.broadcast %37 : vector<1x16x16xf32> to vector<4x16x16xf32>
    %39 = arith.mulf %36, %38 : vector<4x16x16xf32>
    %40 = arith.addf %34, %39 : vector<4x16x16xf32>
    %c0_25 = arith.constant 0 : index
    %c0_26 = arith.constant 0 : index
    %c0_27 = arith.constant 0 : index
    %41 = vector.load %arg9[%c0_25, %c0_26, %c0_27] : memref<4x64x16xbf16, #tpu.memory_space<vmem>>, vector<4x64x16xbf16>
    "tpu.trace_start"() <{level = 10 : i32, message = "nsh,nhd->nsd"}> : () -> ()
    %cst_28 = arith.constant dense<0.000000e+00> : vector<4x16x16xf32>
    %42 = tpu.matmul %16, %41, %cst_28 {dimension_numbers = #tpu.dot_dimension_numbers<[2], [1], [1], [2], [0, 0, 0, 1, 1, 2], [0], [0]>} : vector<4x16x64xbf16>, vector<4x64x16xbf16>, vector<4x16x16xf32> -> vector<4x16x16xf32>
    "tpu.trace_stop"() : () -> ()
    %43 = arith.truncf %29 : vector<4x16x16xf32> to vector<4x16x16xbf16>
    %44 = arith.truncf %40 : vector<4x16x16xf32> to vector<4x16x16xbf16>
    %45 = arith.truncf %42 : vector<4x16x16xf32> to vector<4x16x16xbf16>
    "tpu.trace_start"() <{level = 10 : i32, message = "nsd,ntd->nst"}> : () -> ()
    %cst_29 = arith.constant dense<0.000000e+00> : vector<4x16x16xf32>
    %46 = tpu.matmul %43, %44, %cst_29 {dimension_numbers = #tpu.dot_dimension_numbers<[2], [2], [1], [1], [0, 0, 0, 1, 1, 1], [0], [0]>} : vector<4x16x16xbf16>, vector<4x16x16xbf16>, vector<4x16x16xf32> -> vector<4x16x16xf32>
    "tpu.trace_stop"() : () -> ()
    %c0_30 = arith.constant 0 : index
    %c0_31 = arith.constant 0 : index
    %47 = vector.load %arg1[%c0_30, %c0_31] : memref<16x16xf32, #tpu.memory_space<vmem>>, vector<16x16xf32>
    %48 = vector.shape_cast %47 : vector<16x16xf32> to vector<1x16x16xf32>
    %49 = vector.broadcast %48 : vector<1x16x16xf32> to vector<4x16x16xf32>
    %50 = arith.addf %46, %49 : vector<4x16x16xf32>
    %cst_32 = arith.constant dense<0xFF800000> : vector<4x16xf32>
    %51 = vector.multi_reduction <maximumf>, %50, %cst_32 [2] : vector<4x16x16xf32> to vector<4x16xf32>
    %52 = vector.shape_cast %51 : vector<4x16xf32> to vector<4x16x1xf32>
    %53 = vector.broadcast %52 : vector<4x16x1xf32> to vector<4x16x16xf32>
    %54 = arith.subf %50, %53 : vector<4x16x16xf32>
    %55 = math.exp %54 : vector<4x16x16xf32>
    %cst_33 = arith.constant dense<0.000000e+00> : vector<4x16xf32>
    %56 = vector.multi_reduction <add>, %55, %cst_33 [2] : vector<4x16x16xf32> to vector<4x16xf32>
    %57 = vector.shape_cast %56 : vector<4x16xf32> to vector<4x16x1xf32>
    %58 = tpu.reciprocal %57 {approx = true} : vector<4x16x1xf32> -> vector<4x16x1xf32>
    %59 = vector.broadcast %58 : vector<4x16x1xf32> to vector<4x16x16xf32>
    %60 = arith.mulf %55, %59 : vector<4x16x16xf32>
    %61 = arith.truncf %60 : vector<4x16x16xf32> to vector<4x16x16xbf16>
    "tpu.trace_start"() <{level = 10 : i32, message = "nst,ntd->nsd"}> : () -> ()
    %cst_34 = arith.constant dense<0.000000e+00> : vector<4x16x16xf32>
    %62 = tpu.matmul %61, %45, %cst_34 {dimension_numbers = #tpu.dot_dimension_numbers<[2], [1], [1], [2], [0, 0, 0, 1, 1, 2], [0], [0]>} : vector<4x16x16xbf16>, vector<4x16x16xbf16>, vector<4x16x16xf32> -> vector<4x16x16xf32>
    "tpu.trace_stop"() : () -> ()
    %63 = arith.truncf %62 : vector<4x16x16xf32> to vector<4x16x16xbf16>
    %c0_35 = arith.constant 0 : index
    %c0_36 = arith.constant 0 : index
    %c0_37 = arith.constant 0 : index
    %64 = vector.load %arg10[%c0_35, %c0_36, %c0_37] : memref<4x16x64xbf16, #tpu.memory_space<vmem>>, vector<4x16x64xbf16>
    "tpu.trace_start"() <{level = 10 : i32, message = "nsd,ndh->nsh"}> : () -> ()
    %cst_38 = arith.constant dense<0.000000e+00> : vector<4x16x64xf32>
    %65 = tpu.matmul %63, %64, %cst_38 {dimension_numbers = #tpu.dot_dimension_numbers<[2], [1], [1], [2], [0, 0, 0, 1, 1, 2], [0], [0]>} : vector<4x16x16xbf16>, vector<4x16x64xbf16>, vector<4x16x64xf32> -> vector<4x16x64xf32>
    "tpu.trace_stop"() : () -> ()
    %cst_39 = arith.constant dense<0.000000e+00> : vector<16x64xf32>
    %66 = vector.multi_reduction <add>, %65, %cst_39 [0] : vector<4x16x64xf32> to vector<16x64xf32>
    %67 = arith.addf %0, %66 : vector<16x64xf32>
    %c0_40 = arith.constant 0 : index
    %c0_41 = arith.constant 0 : index
    %68 = vector.load %arg11[%c0_40, %c0_41] : memref<1x64xf32, #tpu.memory_space<vmem>>, vector<1x64xf32>
    %69 = arith.mulf %67, %67 : vector<16x64xf32>
    %cst_42 = arith.constant dense<0.000000e+00> : vector<16xf32>
    %70 = vector.multi_reduction <add>, %69, %cst_42 [1] : vector<16x64xf32> to vector<16xf32>
    %71 = vector.shape_cast %70 : vector<16xf32> to vector<16x1xf32>
    %cst_43 = arith.constant 6.400000e+01 : f32
    %72 = vector.broadcast %cst_43 : f32 to vector<16x1xf32>
    %73 = arith.divf %71, %72 : vector<16x1xf32>
    %cst_44 = arith.constant 9.99999974E-6 : f32
    %74 = vector.broadcast %cst_44 : f32 to vector<16x1xf32>
    %75 = arith.addf %73, %74 : vector<16x1xf32>
    %76 = math.rsqrt %75 : vector<16x1xf32>
    %77 = vector.broadcast %76 : vector<16x1xf32> to vector<16x64xf32>
    %78 = arith.mulf %67, %77 : vector<16x64xf32>
    %79 = vector.broadcast %68 : vector<1x64xf32> to vector<16x64xf32>
    %80 = arith.mulf %78, %79 : vector<16x64xf32>
    %81 = arith.truncf %80 : vector<16x64xf32> to vector<16x64xbf16>
    %c0_45 = arith.constant 0 : index
    %c0_46 = arith.constant 0 : index
    %82 = vector.load %arg12[%c0_45, %c0_46] : memref<64x256xbf16, #tpu.memory_space<vmem>>, vector<64x256xbf16>
    %cst_47 = arith.constant dense<0.000000e+00> : vector<16x256xf32>
    %83 = tpu.matmul %81, %82, %cst_47 {dimension_numbers = #tpu.dot_dimension_numbers<[1], [0], [0], [1], [0, 0, 1, 1], [], []>} : vector<16x64xbf16>, vector<64x256xbf16>, vector<16x256xf32> -> vector<16x256xf32>
    %84 = vector.extract_strided_slice %83 {offsets = [0, 0], sizes = [16, 128], strides = [1, 1]} : vector<16x256xf32> to vector<16x128xf32>
    %85 = vector.extract_strided_slice %83 {offsets = [0, 128], sizes = [16, 128], strides = [1, 1]} : vector<16x256xf32> to vector<16x128xf32>
    %86 = arith.negf %84 : vector<16x128xf32>
    %87 = math.exp %86 : vector<16x128xf32>
    %cst_48 = arith.constant 1.000000e+00 : f32
    %88 = vector.broadcast %cst_48 : f32 to vector<16x128xf32>
    %89 = arith.addf %88, %87 : vector<16x128xf32>
    %90 = arith.divf %88, %89 : vector<16x128xf32>
    %91 = arith.mulf %84, %90 : vector<16x128xf32>
    %92 = arith.mulf %85, %91 : vector<16x128xf32>
    %93 = arith.truncf %92 : vector<16x128xf32> to vector<16x128xbf16>
    %c0_49 = arith.constant 0 : index
    %c0_50 = arith.constant 0 : index
    %94 = vector.load %arg13[%c0_49, %c0_50] : memref<128x64xbf16, #tpu.memory_space<vmem>>, vector<128x64xbf16>
    %cst_51 = arith.constant dense<0.000000e+00> : vector<16x64xf32>
    %95 = tpu.matmul %93, %94, %cst_51 {dimension_numbers = #tpu.dot_dimension_numbers<[1], [0], [0], [1], [0, 0, 1, 1], [], []>} : vector<16x128xbf16>, vector<128x64xbf16>, vector<16x64xf32> -> vector<16x64xf32>
    %96 = arith.addf %67, %95 : vector<16x64xf32>
    %c0_52 = arith.constant 0 : index
    %c0_53 = arith.constant 0 : index
    %97 = vector.load %arg14[%c0_52, %c0_53] : memref<16x64xf32, #tpu.memory_space<vmem>>, vector<16x64xf32>
    tpu.vector_store %arg14[%c0_52, %c0_53], %96 {strides = array<i32>} : memref<16x64xf32, #tpu.memory_space<vmem>>, vector<16x64xf32>,
    return
  }
}

</mosaic_0001>

<bundles_post_ra>
// kernel: tpu_custom_call.1
= control target key start
LH: loop header
LB: loop body
LE: loop exit
PB: predicated region body
PF: predicated region fallthrough
CT: control target
= control target key end

     0   :  { %vm54_vm0 = vcmask 523264   ;;  %v3339_v8 = vmov 0.0   ;;  %vm3340_vm1 = vmmov 0   ;;  %s4120_s0 = inlined_call_operand.vmem [shape: f32[16,64], index: 0, kind: input, shape index: {}]   ;;  %s4121_s1 = inlined_call_operand.vmem [shape: f32[16,16], index: 1, kind: input, shape index: {}]   ;;  %s4122_s2 = inlined_call_operand.vmem [shape: f32[16,16], index: 2, kind: input, shape index: {}]   ;;  %s4123_s3 = inlined_call_operand.vmem [shape: f32[16,16], index: 3, kind: input, shape index: {}]   ;;  %s4124_s4 = inlined_call_operand.vmem [shape: f32[1,64], index: 4, kind: input, shape index: {}]   ;;  %s4125_s5 = inlined_call_operand.vmem [shape: bf16[4,64,16], index: 5, kind: input, shape index: {}]   ;;  %s4126_s6 = inlined_call_operand.vmem [shape: bf16[4,64,16], index: 6, kind: input, shape index: {}]   ;;  %s4127_s7 = inlined_call_operand.vmem [shape: bf16[4,64,16], index: 7, kind: input, shape index: {}]   ;;  %s4128_s8 = inlined_call_operand.vmem [shape: bf16[4,64,16], index: 8, kind: input, shape index: {}]   ;;  %s4129_s9 = inlined_call_operand.vmem [shape: bf16[4,64,16], index: 9, kind: input, shape index: {}]   ;;  %s4130_s10 = inlined_call_operand.vmem [shape: bf16[4,16,64], index: 10, kind: input, shape index: {}]   ;;  %s4131_s11 = inlined_call_operand.vmem [shape: f32[1,64], index: 11, kind: input, shape index: {}]   ;;  %s4132_s12 = inlined_call_operand.vmem [shape: bf16[64,256], index: 12, kind: input, shape index: {}]   ;;  %s4133_s13 = inlined_call_operand.vmem [shape: bf16[128,64], index: 13, kind: input, shape index: {}]   ;;  %s4134_s14 = inlined_call_operand.hbm [shape: f32[16,64], index: 14, kind: output, shape index: {}]  }
   0x1   :  { %v49_v0 = vld [vmem:[%s4120_s0] sm:$0xff]  ;;  %v50_v1 = vld [vmem:[%s4120_s0 + $0x8] sm:$0xff]  ;;  %v3163_v6 = vld [vmem:[%s4125_s5 + $0x18] sm:$0xff]   ;;  %2825 = vmatprep.subr.bf16.mxu0 %v3339_v8  ;;  %2837 = vmatprep.subr.bf16.mxu1 %v3339_v8 }
   0x2   :  { %v52_v2 = vmul.f32 %v49_v0, %v49_v0  ;;  %v53_v3 = vmul.f32 %v50_v1, %v50_v1  ;;  %v3164_v7 = vld [vmem:[%s4125_s5 + $0x38] sm:$0xff]   ;;  %2826 = vmatpush3.bf16.msra.mxu0 %v3163_v6  ;;  %v3165_v9 = vld [vmem:[%s4125_s5 + $0x10] sm:$0xff]   ;;  %v3167_v11 = vld [vmem:[%s4125_s5 + $0x8] sm:$0xff]   ;;  %2833 = vmatprep.mubr.msk.bf16.mxu0 %vm3340_vm1, %v3339_v8 }
   0x3   :  { %2838 = vmatpush3.bf16.msra.mxu1 %v3164_v7  ;;  %2827 = vmatprep.subr.bf16.mxu0 %v3339_v8  ;;  %v3166_v10 = vld [vmem:[%s4125_s5 + $0x30] sm:$0xff]   ;;  %v3168_v12 = vld [vmem:[%s4125_s5 + $0x28] sm:$0xff]   ;;  %v3169_v13 = vld [vmem:[%s4125_s5] sm:$0xff]  }
   0x4   :  { %v55_v4 = vsel %vm54_vm0, %v52_v2, 0.0  ;;  %v58_v5 = vsel %vm54_vm0, %v53_v3, 0.0  ;;  %2839 = vmatprep.subr.bf16.mxu1 %v3339_v8  ;;  %v3170_v14 = vld [vmem:[%s4125_s5 + $0x20] sm:$0xff]   ;;  %2845 = vmatprep.mubr.msk.bf16.mxu1 %vm3340_vm1, %v3339_v8 }
   0x5   :  { %56 = vadd.xlane.f32.xlu0 %v55_v4 }
   0x6   :  { %2828 = vmatpush3.bf16.msra.mxu0 %v3165_v9 }
   0x7   :  { %2840 = vmatpush3.bf16.msra.mxu1 %v3166_v10  ;;  %2829 = vmatprep.subr.bf16.mxu0 %v3339_v8 }
   0x8   :  { %2841 = vmatprep.subr.bf16.mxu1 %v3339_v8 }
   0x9   :  { %59 = vadd.xlane.f32.xlu0 %v58_v5 }
   0xa   :  { %2830 = vmatpush3.bf16.msra.mxu0 %v3167_v11 }
   0xb   :  { %2842 = vmatpush3.bf16.msra.mxu1 %v3168_v12  ;;  %2831 = vmatprep.subr.bf16.mxu0 %v3339_v8 }
   0xc   :  { %2843 = vmatprep.subr.bf16.mxu1 %v3339_v8 }
   0xe   :  { %2832 = vmatpush3.bf16.msra.mxu0 %v3169_v13 }
   0xf   :  { %2844 = vmatpush3.bf16.msra.mxu1 %v3170_v14  ;;  %2849 = vmatprep.subr.bf16.mxu0 %v3339_v8 }
  0x10   :  { %2861 = vmatprep.subr.bf16.mxu1 %v3339_v8 }
  0x11   :  { %19 = vsyncpa [#allocation3], 0  ;;  %v2555_v24 = vld [vmem:[%s4124_s4] ss:$0 sm:$0xff]  ;;  %v3171_v28 = vld [vmem:[%s4125_s5 + $0x58] sm:$0xff]   ;;  %vm1608_vm2 = vcmask 130048  }
  0x12   :  { %v3172_v29 = vld [vmem:[%s4125_s5 + $0x78] sm:$0xff]   ;;  %v3173_v31 = vld [vmem:[%s4125_s5 + $0x50] sm:$0xff]   ;;  %v3175_v33 = vld [vmem:[%s4125_s5 + $0x48] sm:$0xff]  }
  0x13   :  { %v3174_v32 = vld [vmem:[%s4125_s5 + $0x70] sm:$0xff]   ;;  %v3176_v34 = vld [vmem:[%s4125_s5 + $0x68] sm:$0xff]   ;;  %v3177_v35 = vld [vmem:[%s4125_s5 + $0x40] sm:$0xff]  }
  0x14   :  { %v3178_v36 = vld [vmem:[%s4125_s5 + $0x60] sm:$0xff]   ;;  %v3179_v37 = vld [vmem:[%s4126_s6 + $0x18] sm:$0xff]   ;;  %v3181_v39 = vld [vmem:[%s4126_s6 + $0x10] sm:$0xff]  }
  0x15   :  { %v3180_v38 = vld [vmem:[%s4126_s6 + $0x38] sm:$0xff]   ;;  %v3182_v40 = vld [vmem:[%s4126_s6 + $0x30] sm:$0xff]   ;;  %v3183_v41 = vld [vmem:[%s4126_s6 + $0x8] sm:$0xff]  }
  0x16   :  { %v3184_v42 = vld [vmem:[%s4126_s6 + $0x28] sm:$0xff]   ;;  %v3185_v43 = vld [vmem:[%s4126_s6] sm:$0xff]   ;;  %v3187_v45 = vld [vmem:[%s4126_s6 + $0x58] sm:$0xff]  }
  0x17   :  { %v3186_v44 = vld [vmem:[%s4126_s6 + $0x20] sm:$0xff]   ;;  %v3188_v46 = vld [vmem:[%s4126_s6 + $0x78] sm:$0xff]   ;;  %v3189_v47 = vld [vmem:[%s4126_s6 + $0x50] sm:$0xff]  }
  0x18   :  { %v3190_v48 = vld [vmem:[%s4126_s6 + $0x70] sm:$0xff]   ;;  %v3191_v49 = vld [vmem:[%s4126_s6 + $0x48] sm:$0xff]   ;;  %v3193_v51 = vld [vmem:[%s4126_s6 + $0x40] sm:$0xff]  }
  0x19   :  { %v3192_v50 = vld [vmem:[%s4126_s6 + $0x68] sm:$0xff]   ;;  %v3194_v52 = vld [vmem:[%s4126_s6 + $0x60] sm:$0xff]   ;;  %v3195_v53 = vld [vmem:[%s4127_s7 + $0x18] sm:$0xff]  }
  0x1a   :  { %v3196_v54 = vld [vmem:[%s4127_s7 + $0x38] sm:$0xff]   ;;  %v3197_v55 = vld [vmem:[%s4127_s7 + $0x10] sm:$0xff]   ;;  %v3199_v57 = vld [vmem:[%s4127_s7 + $0x8] sm:$0xff]  }
  0x1b   :  { %v3198_v56 = vld [vmem:[%s4127_s7 + $0x30] sm:$0xff]   ;;  %v3200_v58 = vld [vmem:[%s4127_s7 + $0x28] sm:$0xff]   ;;  %v3201_v59 = vld [vmem:[%s4127_s7] sm:$0xff]  }
  0x1c   :  { %v3202_v60 = vld [vmem:[%s4127_s7 + $0x20] sm:$0xff]   ;;  %v3203_v61 = vld [vmem:[%s4127_s7 + $0x58] sm:$0xff]   ;;  %v3205_v63 = vld [vmem:[%s4127_s7 + $0x50] sm:$0xff]  }
  0x1d   :  { %v3204_v62 = vld [vmem:[%s4127_s7 + $0x78] sm:$0xff]   ;;  %v3208_v2 = vld [vmem:[%s4127_s7 + $0x68] sm:$0xff]   ;;  %v3209_v3 = vld [vmem:[%s4127_s7 + $0x40] sm:$0xff]  }
  0x1e   :  { %v3210_v4 = vld [vmem:[%s4127_s7 + $0x60] sm:$0xff]   ;;  %v3211_v5 = vld [vmem:[%s4128_s8 + $0x18] sm:$0xff]   ;;  %v3213_v7 = vld [vmem:[%s4128_s8 + $0x10] sm:$0xff]  }
  0x1f   :  { %v3212_v6 = vld [vmem:[%s4128_s8 + $0x38] sm:$0xff]   ;;  %v3214_v9 = vld [vmem:[%s4128_s8 + $0x30] sm:$0xff]   ;;  %v3215_v10 = vld [vmem:[%s4128_s8 + $0x8] sm:$0xff]  }
  0x20   :  { %v3216_v11 = vld [vmem:[%s4128_s8 + $0x28] sm:$0xff]   ;;  %v3217_v12 = vld [vmem:[%s4128_s8] sm:$0xff]   ;;  %v3219_v14 = vld [vmem:[%s4128_s8 + $0x58] sm:$0xff]  }
  0x21   :  { %v3218_v13 = vld [vmem:[%s4128_s8 + $0x20] sm:$0xff]  }
  0x8e   :  { %v57_v15 = vpop.xlane.xlu0 %56 }
  0x8f   :  { %v62_v16 = vmul.f32 0.015625, %v57_v15  ;;  %v3220_v15 = vld [vmem:[%s4128_s8 + $0x78] sm:$0xff]  }
  0x91   :  { %v64_v17 = vadd.f32 1e-05, %v62_v16  ;;  %v3221_v16 = vld [vmem:[%s4128_s8 + $0x50] sm:$0xff]  }
  0x92   :  { %v60_v18 = vpop.xlane.xlu0 %59 }
  0x93   :  { %3267 = vrsqrt.f32 %v64_v17  ;;  %v63_v19 = vmul.f32 0.015625, %v60_v18  ;;  %v3222_v17 = vld [vmem:[%s4128_s8 + $0x70] sm:$0xff]   ;;  %v3223_v18 = vld [vmem:[%s4128_s8 + $0x48] sm:$0xff]  }
  0x95   :  { %v65_v20 = vadd.f32 1e-05, %v63_v19  ;;  %v3224_v19 = vld [vmem:[%s4128_s8 + $0x68] sm:$0xff]  }
  0x97   :  { %3269 = vrsqrt.f32 %v65_v20  ;;  %v3225_v20 = vld [vmem:[%s4128_s8 + $0x40] sm:$0xff]  }
  0xa0   :  { %v3268_v21 = vpop.eup %3267 }
  0xa1   :  { %v68_v22 = vmul.f32 %v3268_v21, %v49_v0  ;;  %v3206_v0 = vld [vmem:[%s4127_s7 + $0x70] sm:$0xff]   ;;  %v3226_v21 = vld [vmem:[%s4128_s8 + $0x60] sm:$0xff]  }
  0xa3   :  { %v76_v26 = vmul.f32 %v2555_v24, %v68_v22  ;;  %v3227_v22 = vld [vmem:[%s4129_s9 + $0x18] sm:$0xff]  }
  0xa4   :  { %v3270_v23 = vpop.eup %3269 }
  0xa5   :  { %v69_v25 = vmul.f32 %v3270_v23, %v50_v1  ;;  %v3207_v1 = vld [vmem:[%s4127_s7 + $0x48] sm:$0xff]   ;;  %v3228_v23 = vld [vmem:[%s4129_s9 + $0x38] sm:$0xff]  }
  0xa7   :  { %v77_v27 = vmul.f32 %v2555_v24, %v69_v25  ;;  %v3229_v24 = vld [vmem:[%s4129_s9 + $0x10] sm:$0xff]  }
  0xa8   :  { %v3230_v25 = vld [vmem:[%s4129_s9 + $0x30] sm:$0xff]  }
  0xa9   :  { %v3475_v30 = vpack.c.bf16 %v77_v27, %v76_v26  ;;  %v3231_v26 = vld [vmem:[%s4129_s9 + $0x8] sm:$0xff]  }
  0xaa   :  { %v3232_v27 = vld [vmem:[%s4129_s9 + $0x28] sm:$0xff]  }
  0xab   :  { %2834 = vmatmul.mubr.msk.bf16.vlgmr.msra.gmra.mxu0 %vm54_vm0, %v3475_v30  ;;  %2846 = vmatmul.mubr.msk.bf16.vlgmr.msra.gmra.mxu1 %vm54_vm0, %v3475_v30 }
  0xac   :  { %2850 = vmatpush3.bf16.msra.mxu0 %v3171_v28  ;;  %2862 = vmatpush3.bf16.msra.mxu1 %v3172_v29  ;;  %v3233_v28 = vld [vmem:[%s4129_s9] sm:$0xff]  }
  0xad   :  { %2851 = vmatprep.subr.bf16.mxu0 %v3339_v8  ;;  %2863 = vmatprep.subr.bf16.mxu1 %v3339_v8  ;;  %v3234_v29 = vld [vmem:[%s4129_s9 + $0x20] sm:$0xff]  }
  0xae   :  { %2857 = vmatprep.mubr.msk.bf16.mxu0 %vm3340_vm1, %v3339_v8  ;;  %2869 = vmatprep.mubr.msk.bf16.mxu1 %vm3340_vm1, %v3339_v8 }
  0xb0   :  { %2852 = vmatpush3.bf16.msra.mxu0 %v3173_v31  ;;  %2864 = vmatpush3.bf16.msra.mxu1 %v3174_v32  ;;  %v3235_v31 = vld [vmem:[%s4129_s9 + $0x58] sm:$0xff]  }
  0xb1   :  { %2853 = vmatprep.subr.bf16.mxu0 %v3339_v8  ;;  %2865 = vmatprep.subr.bf16.mxu1 %v3339_v8  ;;  %v3236_v32 = vld [vmem:[%s4129_s9 + $0x78] sm:$0xff]  }
  0xb4   :  { %2854 = vmatpush3.bf16.msra.mxu0 %v3175_v33  ;;  %2866 = vmatpush3.bf16.msra.mxu1 %v3176_v34  ;;  %v3237_v33 = vld [vmem:[%s4129_s9 + $0x50] sm:$0xff]  }
  0xb5   :  { %2855 = vmatprep.subr.bf16.mxu0 %v3339_v8  ;;  %2867 = vmatprep.subr.bf16.mxu1 %v3339_v8  ;;  %v3238_v34 = vld [vmem:[%s4129_s9 + $0x70] sm:$0xff]  }
  0xb8   :  { %2856 = vmatpush3.bf16.msra.mxu0 %v3177_v35  ;;  %2868 = vmatpush3.bf16.msra.mxu1 %v3178_v36  ;;  %v3239_v35 = vld [vmem:[%s4129_s9 + $0x48] sm:$0xff]  }
  0xb9   :  { %2873 = vmatprep.subr.bf16.mxu0 %v3339_v8  ;;  %2885 = vmatprep.subr.bf16.mxu1 %v3339_v8  ;;  %v3240_v36 = vld [vmem:[%s4129_s9 + $0x68] sm:$0xff]  }
  0xbb   :  { %2858 = vmatmul.mubr.msk.bf16.vlgmr.msra.gmra.mxu0 %vm54_vm0, %v3475_v30  ;;  %2870 = vmatmul.mubr.msk.bf16.vlgmr.msra.gmra.mxu1 %vm54_vm0, %v3475_v30 }
  0xbc   :  { %2874 = vmatpush3.bf16.msra.mxu0 %v3179_v37  ;;  %2886 = vmatpush3.bf16.msra.mxu1 %v3180_v38  ;;  %v3241_v37 = vld [vmem:[%s4129_s9 + $0x40] sm:$0xff]  }
  0xbd   :  { %2875 = vmatprep.subr.bf16.mxu0 %v3339_v8  ;;  %2887 = vmatprep.subr.bf16.mxu1 %v3339_v8  ;;  %v3242_v38 = vld [vmem:[%s4129_s9 + $0x60] sm:$0xff]  }
  0xbe   :  { %2881 = vmatprep.mubr.msk.bf16.mxu0 %vm3340_vm1, %v3339_v8  ;;  %2893 = vmatprep.mubr.msk.bf16.mxu1 %vm3340_vm1, %v3339_v8 }
  0xc0   :  { %2876 = vmatpush3.bf16.msra.mxu0 %v3181_v39  ;;  %2888 = vmatpush3.bf16.msra.mxu1 %v3182_v40 }
  0xc1   :  { %2877 = vmatprep.subr.bf16.mxu0 %v3339_v8  ;;  %2889 = vmatprep.subr.bf16.mxu1 %v3339_v8 }
  0xc4   :  { %2878 = vmatpush3.bf16.msra.mxu0 %v3183_v41  ;;  %2890 = vmatpush3.bf16.msra.mxu1 %v3184_v42 }
  0xc5   :  { %2879 = vmatprep.subr.bf16.mxu0 %v3339_v8  ;;  %2891 = vmatprep.subr.bf16.mxu1 %v3339_v8 }
  0xc8   :  { %2880 = vmatpush3.bf16.msra.mxu0 %v3185_v43  ;;  %2892 = vmatpush3.bf16.msra.mxu1 %v3186_v44 }
  0xc9   :  { %2897 = vmatprep.subr.bf16.mxu0 %v3339_v8  ;;  %2909 = vmatprep.subr.bf16.mxu1 %v3339_v8 }
  0xcb   :  { %2882 = vmatmul.mubr.msk.bf16.vlgmr.msra.gmra.mxu0 %vm54_vm0, %v3475_v30  ;;  %2894 = vmatmul.mubr.msk.bf16.vlgmr.msra.gmra.mxu1 %vm54_vm0, %v3475_v30 }
  0xcc   :  { %2898 = vmatpush3.bf16.msra.mxu0 %v3187_v45  ;;  %2910 = vmatpush3.bf16.msra.mxu1 %v3188_v46 }
  0xcd   :  { %2899 = vmatprep.subr.bf16.mxu0 %v3339_v8  ;;  %2911 = vmatprep.subr.bf16.mxu1 %v3339_v8 }
  0xce   :  { %2905 = vmatprep.mubr.msk.bf16.mxu0 %vm3340_vm1, %v3339_v8  ;;  %2917 = vmatprep.mubr.msk.bf16.mxu1 %vm3340_vm1, %v3339_v8 }
  0xd0   :  { %2900 = vmatpush3.bf16.msra.mxu0 %v3189_v47  ;;  %2912 = vmatpush3.bf16.msra.mxu1 %v3190_v48 }
  0xd1   :  { %2901 = vmatprep.subr.bf16.mxu0 %v3339_v8  ;;  %2913 = vmatprep.subr.bf16.mxu1 %v3339_v8 }
  0xd4   :  { %2902 = vmatpush3.bf16.msra.mxu0 %v3191_v49  ;;  %2914 = vmatpush3.bf16.msra.mxu1 %v3192_v50 }
  0xd5   :  { %2903 = vmatprep.subr.bf16.mxu0 %v3339_v8  ;;  %2915 = vmatprep.subr.bf16.mxu1 %v3339_v8 }
  0xd8   :  { %2904 = vmatpush3.bf16.msra.mxu0 %v3193_v51  ;;  %2916 = vmatpush3.bf16.msra.mxu1 %v3194_v52 }
  0xd9   :  { %2921 = vmatprep.subr.bf16.mxu0 %v3339_v8  ;;  %2933 = vmatprep.subr.bf16.mxu1 %v3339_v8 }
  0xdb   :  { %2906 = vmatmul.mubr.msk.bf16.vlgmr.msra.gmra.mxu0 %vm54_vm0, %v3475_v30  ;;  %2918 = vmatmul.mubr.msk.bf16.vlgmr.msra.gmra.mxu1 %vm54_vm0, %v3475_v30 }
  0xdc   :  { %2922 = vmatpush3.bf16.msra.mxu0 %v3195_v53  ;;  %2934 = vmatpush3.bf16.msra.mxu1 %v3196_v54  ;;  %v3842_v54 = vld [vmem:[%s4122_s2] sm:$0xff] }
  0xdd   :  { %2923 = vmatprep.subr.bf16.mxu0 %v3339_v8  ;;  %2935 = vmatprep.subr.bf16.mxu1 %v3339_v8 }
  0xde   :  { %2929 = vmatprep.mubr.msk.bf16.mxu0 %vm3340_vm1, %v3339_v8  ;;  %2941 = vmatprep.mubr.msk.bf16.mxu1 %vm3340_vm1, %v3339_v8 }
  0xe0   :  { %2924 = vmatpush3.bf16.msra.mxu0 %v3197_v55  ;;  %2936 = vmatpush3.bf16.msra.mxu1 %v3198_v56  ;;  %v3847_v55 = vld [vmem:[%s4123_s3] sm:$0xff] }
  0xe1   :  { %2925 = vmatprep.subr.bf16.mxu0 %v3339_v8  ;;  %2937 = vmatprep.subr.bf16.mxu1 %v3339_v8 }
  0xe4   :  { %2926 = vmatpush3.bf16.msra.mxu0 %v3199_v57  ;;  %2938 = vmatpush3.bf16.msra.mxu1 %v3200_v58 }
  0xe5   :  { %2927 = vmatprep.subr.bf16.mxu0 %v3339_v8  ;;  %2939 = vmatprep.subr.bf16.mxu1 %v3339_v8 }
  0xe8   :  { %2928 = vmatpush3.bf16.msra.mxu0 %v3201_v59  ;;  %2940 = vmatpush3.bf16.msra.mxu1 %v3202_v60 }
  0xe9   :  { %2945 = vmatprep.subr.bf16.mxu0 %v3339_v8  ;;  %2957 = vmatprep.subr.bf16.mxu1 %v3339_v8 }
  0xeb   :  { %2930 = vmatmul.mubr.msk.bf16.vlgmr.msra.gmra.mxu0 %vm54_vm0, %v3475_v30  ;;  %2942 = vmatmul.mubr.msk.bf16.vlgmr.msra.gmra.mxu1 %vm54_vm0, %v3475_v30 }
  0xec   :  { %2946 = vmatpush3.bf16.msra.mxu0 %v3203_v61  ;;  %2958 = vmatpush3.bf16.msra.mxu1 %v3204_v62  ;;  %v3856_v62 = vld [vmem:[%s4122_s2 + $0x8] sm:$0xff] }
  0xed   :  { %2947 = vmatprep.subr.bf16.mxu0 %v3339_v8  ;;  %2959 = vmatprep.subr.bf16.mxu1 %v3339_v8 }
  0xee   :  { %2953 = vmatprep.mubr.msk.bf16.mxu0 %vm3340_vm1, %v3339_v8  ;;  %2965 = vmatprep.mubr.msk.bf16.mxu1 %vm3340_vm1, %v3339_v8 }
  0xf0   :  { %2948 = vmatpush3.bf16.msra.mxu0 %v3205_v63  ;;  %2960 = vmatpush3.bf16.msra.mxu1 %v3206_v0 }
  0xf1   :  { %2949 = vmatprep.subr.bf16.mxu0 %v3339_v8  ;;  %2961 = vmatprep.subr.bf16.mxu1 %v3339_v8 }
  0xf4   :  { %2950 = vmatpush3.bf16.msra.mxu0 %v3207_v1  ;;  %2962 = vmatpush3.bf16.msra.mxu1 %v3208_v2  ;;  %v3861_v1 = vld [vmem:[%s4123_s3 + $0x8] sm:$0xff] }
  0xf5   :  { %2951 = vmatprep.subr.bf16.mxu0 %v3339_v8  ;;  %2963 = vmatprep.subr.bf16.mxu1 %v3339_v8 }
  0xf8   :  { %2952 = vmatpush3.bf16.msra.mxu0 %v3209_v3  ;;  %2964 = vmatpush3.bf16.msra.mxu1 %v3210_v4 }
  0xf9   :  { %2969 = vmatprep.subr.bf16.mxu0 %v3339_v8  ;;  %2981 = vmatprep.subr.bf16.mxu1 %v3339_v8 }
  0xfb   :  { %2954 = vmatmul.mubr.msk.bf16.vlgmr.msra.gmra.mxu0 %vm54_vm0, %v3475_v30  ;;  %2966 = vmatmul.mubr.msk.bf16.vlgmr.msra.gmra.mxu1 %vm54_vm0, %v3475_v30 }
  0xfc   :  { %2970 = vmatpush3.bf16.msra.mxu0 %v3211_v5  ;;  %2982 = vmatpush3.bf16.msra.mxu1 %v3212_v6 }
  0xfd   :  { %2971 = vmatprep.subr.bf16.mxu0 %v3339_v8  ;;  %2983 = vmatprep.subr.bf16.mxu1 %v3339_v8 }
  0xfe   :  { %2977 = vmatprep.mubr.msk.bf16.mxu0 %vm3340_vm1, %v3339_v8  ;;  %2989 = vmatprep.mubr.msk.bf16.mxu1 %vm3340_vm1, %v3339_v8 }
 0x100   :  { %2972 = vmatpush3.bf16.msra.mxu0 %v3213_v7  ;;  %2984 = vmatpush3.bf16.msra.mxu1 %v3214_v9 }
 0x101   :  { %2973 = vmatprep.subr.bf16.mxu0 %v3339_v8  ;;  %2985 = vmatprep.subr.bf16.mxu1 %v3339_v8 }
 0x104   :  { %2974 = vmatpush3.bf16.msra.mxu0 %v3215_v10  ;;  %2986 = vmatpush3.bf16.msra.mxu1 %v3216_v11 }
 0x105   :  { %2975 = vmatprep.subr.bf16.mxu0 %v3339_v8  ;;  %2987 = vmatprep.subr.bf16.mxu1 %v3339_v8 }
 0x108   :  { %2976 = vmatpush3.bf16.msra.mxu0 %v3217_v12  ;;  %2988 = vmatpush3.bf16.msra.mxu1 %v3218_v13 }
 0x109   :  { %2993 = vmatprep.subr.bf16.mxu0 %v3339_v8  ;;  %3005 = vmatprep.subr.bf16.mxu1 %v3339_v8 }
 0x10b   :  { %2978 = vmatmul.mubr.msk.bf16.vlgmr.msra.gmra.mxu0 %vm54_vm0, %v3475_v30  ;;  %2990 = vmatmul.mubr.msk.bf16.vlgmr.msra.gmra.mxu1 %vm54_vm0, %v3475_v30 }
 0x10c   :  { %2994 = vmatpush3.bf16.msra.mxu0 %v3219_v14  ;;  %3006 = vmatpush3.bf16.msra.mxu1 %v3220_v15 }
 0x10d   :  { %2995 = vmatprep.subr.bf16.mxu0 %v3339_v8  ;;  %3007 = vmatprep.subr.bf16.mxu1 %v3339_v8 }
 0x10e   :  { %3001 = vmatprep.mubr.msk.bf16.mxu0 %vm3340_vm1, %v3339_v8  ;;  %3013 = vmatprep.mubr.msk.bf16.mxu1 %vm3340_vm1, %v3339_v8 }
 0x110   :  { %2996 = vmatpush3.bf16.msra.mxu0 %v3221_v16  ;;  %3008 = vmatpush3.bf16.msra.mxu1 %v3222_v17 }
 0x111   :  { %2997 = vmatprep.subr.bf16.mxu0 %v3339_v8  ;;  %3009 = vmatprep.subr.bf16.mxu1 %v3339_v8 }
 0x114   :  { %2998 = vmatpush3.bf16.msra.mxu0 %v3223_v18  ;;  %3010 = vmatpush3.bf16.msra.mxu1 %v3224_v19 }
 0x115   :  { %2999 = vmatprep.subr.bf16.mxu0 %v3339_v8  ;;  %3011 = vmatprep.subr.bf16.mxu1 %v3339_v8 }
 0x118   :  { %3000 = vmatpush3.bf16.msra.mxu0 %v3225_v20  ;;  %3012 = vmatpush3.bf16.msra.mxu1 %v3226_v21 }
 0x119   :  { %3017 = vmatprep.subr.bf16.mxu0 %v3339_v8  ;;  %3029 = vmatprep.subr.bf16.mxu1 %v3339_v8 }
 0x11b   :  { %3002 = vmatmul.mubr.msk.bf16.vlgmr.msra.gmra.mxu0 %vm54_vm0, %v3475_v30  ;;  %3014 = vmatmul.mubr.msk.bf16.vlgmr.msra.gmra.mxu1 %vm54_vm0, %v3475_v30 }
 0x11c   :  { %3018 = vmatpush3.bf16.msra.mxu0 %v3227_v22  ;;  %3030 = vmatpush3.bf16.msra.mxu1 %v3228_v23 }
 0x11d   :  { %3019 = vmatprep.subr.bf16.mxu0 %v3339_v8  ;;  %3031 = vmatprep.subr.bf16.mxu1 %v3339_v8 }
 0x11e   :  { %3025 = vmatprep.mubr.msk.bf16.mxu0 %vm3340_vm1, %v3339_v8  ;;  %3037 = vmatprep.mubr.msk.bf16.mxu1 %vm3340_vm1, %v3339_v8 }
 0x120   :  { %3020 = vmatpush3.bf16.msra.mxu0 %v3229_v24  ;;  %3032 = vmatpush3.bf16.msra.mxu1 %v3230_v25 }
 0x121   :  { %3021 = vmatprep.subr.bf16.mxu0 %v3339_v8  ;;  %3033 = vmatprep.subr.bf16.mxu1 %v3339_v8 }
 0x124   :  { %3022 = vmatpush3.bf16.msra.mxu0 %v3231_v26  ;;  %3034 = vmatpush3.bf16.msra.mxu1 %v3232_v27 }
 0x125   :  { %3023 = vmatprep.subr.bf16.mxu0 %v3339_v8  ;;  %3035 = vmatprep.subr.bf16.mxu1 %v3339_v8 }
 0x128   :  { %3024 = vmatpush3.bf16.msra.mxu0 %v3233_v28  ;;  %3036 = vmatpush3.bf16.msra.mxu1 %v3234_v29 }
 0x129   :  { %3041 = vmatprep.subr.bf16.mxu0 %v3339_v8  ;;  %3053 = vmatprep.subr.bf16.mxu1 %v3339_v8 }
 0x12b   :  { %3026 = vmatmul.mubr.msk.bf16.vlgmr.msra.gmra.mxu0 %vm54_vm0, %v3475_v30  ;;  %3038 = vmatmul.mubr.msk.bf16.vlgmr.msra.gmra.mxu1 %vm54_vm0, %v3475_v30 }
 0x12c   :  { %3042 = vmatpush3.bf16.msra.mxu0 %v3235_v31  ;;  %3054 = vmatpush3.bf16.msra.mxu1 %v3236_v32 }
 0x12d   :  { %3043 = vmatprep.subr.bf16.mxu0 %v3339_v8  ;;  %3055 = vmatprep.subr.bf16.mxu1 %v3339_v8 }
 0x12e   :  { %3049 = vmatprep.mubr.msk.bf16.mxu0 %vm3340_vm1, %v3339_v8  ;;  %3061 = vmatprep.mubr.msk.bf16.mxu1 %vm3340_vm1, %v3339_v8 }
 0x130   :  { %3044 = vmatpush3.bf16.msra.mxu0 %v3237_v33  ;;  %3056 = vmatpush3.bf16.msra.mxu1 %v3238_v34 }
 0x131   :  { %3045 = vmatprep.subr.bf16.mxu0 %v3339_v8  ;;  %3057 = vmatprep.subr.bf16.mxu1 %v3339_v8 }
 0x134   :  { %3046 = vmatpush3.bf16.msra.mxu0 %v3239_v35  ;;  %3058 = vmatpush3.bf16.msra.mxu1 %v3240_v36 }
 0x135   :  { %3047 = vmatprep.subr.bf16.mxu0 %v3339_v8  ;;  %3059 = vmatprep.subr.bf16.mxu1 %v3339_v8 }
 0x138   :  { %3048 = vmatpush3.bf16.msra.mxu0 %v3241_v37  ;;  %3060 = vmatpush3.bf16.msra.mxu1 %v3242_v38 }
 0x139   :  { %3065 = vmatprep.subr.bf16.mxu0 %v3339_v8  ;;  %3083 = vmatprep.subr.bf16.mxu1 %v3339_v8 }
 0x13b   :  { %3050 = vmatmul.mubr.msk.bf16.vlgmr.msra.gmra.mxu0 %vm54_vm0, %v3475_v30  ;;  %3062 = vmatmul.mubr.msk.bf16.vlgmr.msra.gmra.mxu1 %vm54_vm0, %v3475_v30 }
 0x13c   :  { %3067 = vmatprep.mubr.msk.bf16.mxu0 %vm3340_vm1, %v3339_v8  ;;  %3085 = vmatprep.mubr.msk.bf16.mxu1 %vm3340_vm1, %v3339_v8 }
 0x16b   :  { %v176_v39 = vpop.f32.mrf.mxu0  ;;  %v241_v40 = vpop.f32.mrf.mxu1 }
 0x16c   :  { %v378_v58 = vmul.f32 %v176_v39, %v3842_v54  ;;  %v380_v59 = vmul.f32 %v241_v40, %v3842_v54 }
 0x16d   :  { %v2835_v41 = vpop.f32.mrf.mxu0  ;;  %v2847_v42 = vpop.f32.mrf.mxu1 }
 0x16f   :  { %v179_v43 = vpop.f32.mrf.mxu0  ;;  %v244_v44 = vpop.f32.mrf.mxu1 }
 0x170   :  { %v379_v6 = vmul.f32 %v179_v43, %v3856_v62  ;;  %v381_v7 = vmul.f32 %v244_v44, %v3856_v62 }
 0x171   :  { %v2836_v45 = vpop.f32.mrf.mxu0  ;;  %v2848_v46 = vpop.f32.mrf.mxu1 }
 0x17b   :  { %v306_v47 = vpop.f32.mrf.mxu0  ;;  %v371_v48 = vpop.f32.mrf.mxu1 }
 0x17c   :  { %v382_v19 = vmul.f32 %v306_v47, %v3842_v54  ;;  %v384_v20 = vmul.f32 %v371_v48, %v3842_v54 }
 0x17d   :  { %v2859_v49 = vpop.f32.mrf.mxu0  ;;  %v2871_v50 = vpop.f32.mrf.mxu1 }
 0x17f   :  { %v309_v51 = vpop.f32.mrf.mxu0  ;;  %v374_v30 = vpop.f32.mrf.mxu1 }
 0x180   :  { %v383_v29 = vmul.f32 %v309_v51, %v3856_v62  ;;  %v385_v31 = vmul.f32 %v374_v30, %v3856_v62 }
 0x181   :  { %v2860_v52 = vpop.f32.mrf.mxu0  ;;  %v2872_v53 = vpop.f32.mrf.mxu1 }
 0x18b   :  { %v476_v56 = vpop.f32.mrf.mxu0  ;;  %v541_v57 = vpop.f32.mrf.mxu1 }
 0x18c   :  { %v678_v60 = vmul.f32 %v476_v56, %v3847_v55  ;;  %v680_v61 = vmul.f32 %v541_v57, %v3847_v55 }
 0x18d   :  { %v2883_v63 = vpop.f32.mrf.mxu0  ;;  %v2895_v0 = vpop.f32.mrf.mxu1 }
 0x18e   :  { %v3863_v2 = vadd.f32 %v678_v60, %v378_v58  ;;  %v3865_v3 = vadd.f32 %v680_v61, %v380_v59 }
 0x18f   :  { %v479_v4 = vpop.f32.mrf.mxu0  ;;  %v544_v5 = vpop.f32.mrf.mxu1 }
 0x190   :  { %v679_v9 = vmul.f32 %v479_v4, %v3861_v1  ;;  %v681_v10 = vmul.f32 %v544_v5, %v3861_v1 }
 0x191   :  { %v2884_v11 = vpop.f32.mrf.mxu0  ;;  %v2896_v12 = vpop.f32.mrf.mxu1 }
 0x192   :  { %v3871_v13 = vadd.f32 %v679_v9, %v379_v6  ;;  %v3873_v14 = vadd.f32 %v681_v10, %v381_v7 }
 0x194   :  { %v1594_v15 = vpack.c.bf16 %v3871_v13, %v3863_v2  ;;  %v1595_v16 = vpack.c.bf16 %v3873_v14, %v3865_v3 }
 0x19b   :  { %v606_v17 = vpop.f32.mrf.mxu0  ;;  %v671_v18 = vpop.f32.mrf.mxu1 }
 0x19c   :  { %v682_v21 = vmul.f32 %v606_v17, %v3847_v55  ;;  %v684_v22 = vmul.f32 %v671_v18, %v3847_v55 }
 0x19d   :  { %v2907_v23 = vpop.f32.mrf.mxu0  ;;  %v2919_v24 = vpop.f32.mrf.mxu1 }
 0x19e   :  { %v3883_v25 = vadd.f32 %v682_v21, %v382_v19  ;;  %v3885_v26 = vadd.f32 %v684_v22, %v384_v20 }
 0x19f   :  { %v609_v27 = vpop.f32.mrf.mxu0  ;;  %v674_v28 = vpop.f32.mrf.mxu1 }
 0x1a0   :  { %v683_v32 = vmul.f32 %v609_v27, %v3861_v1  ;;  %v685_v33 = vmul.f32 %v674_v28, %v3861_v1 }
 0x1a1   :  { %v2908_v34 = vpop.f32.mrf.mxu0  ;;  %v2920_v35 = vpop.f32.mrf.mxu1 }
 0x1a2   :  { %v3891_v36 = vadd.f32 %v683_v32, %v383_v29  ;;  %v3893_v37 = vadd.f32 %v685_v33, %v385_v31 }
 0x1a4   :  { %v1596_v38 = vpack.c.bf16 %v3891_v36, %v3883_v25  ;;  %v1597_v39 = vpack.c.bf16 %v3893_v37, %v3885_v26 }
 0x1ab   :  { %v784_v40 = vpop.f32.mrf.mxu0  ;;  %v849_v41 = vpop.f32.mrf.mxu1 }
 0x1ac   :  { %v986_v4 = vmul.f32 %v784_v40, %v3842_v54  ;;  %v988_v20 = vmul.f32 %v849_v41, %v3842_v54 }
 0x1ad   :  { %v2931_v42 = vpop.f32.mrf.mxu0  ;;  %v2943_v43 = vpop.f32.mrf.mxu1 }
 0x1af   :  { %v787_v44 = vpop.f32.mrf.mxu0  ;;  %v852_v45 = vpop.f32.mrf.mxu1 }
 0x1b0   :  { %v987_v5 = vmul.f32 %v787_v44, %v3856_v62  ;;  %v989_v17 = vmul.f32 %v852_v45, %v3856_v62 }
 0x1b1   :  { %v2932_v46 = vpop.f32.mrf.mxu0  ;;  %v2944_v47 = vpop.f32.mrf.mxu1 }
 0x1bb   :  { %v914_v48 = vpop.f32.mrf.mxu0  ;;  %v979_v49 = vpop.f32.mrf.mxu1 }
 0x1bc   :  { %v990_v35 = vmul.f32 %v914_v48, %v3842_v54  ;;  %v992_v40 = vmul.f32 %v979_v49, %v3842_v54 }
 0x1bd   :  { %v2955_v50 = vpop.f32.mrf.mxu0  ;;  %v2967_v51 = vpop.f32.mrf.mxu1 }
 0x1bf   :  { %v917_v30 = vpop.f32.mrf.mxu0  ;;  %v982_v52 = vpop.f32.mrf.mxu1 }
 0x1c0   :  { %v991_v43 = vmul.f32 %v917_v30, %v3856_v62 }
 0x1c1   :  { %v2956_v53 = vpop.f32.mrf.mxu0  ;;  %v2968_v56 = vpop.f32.mrf.mxu1 }
 0x1cb   :  { %v1084_v57 = vpop.f32.mrf.mxu0  ;;  %v1149_v58 = vpop.f32.mrf.mxu1 }
 0x1cc   :  { %v1286_v61 = vmul.f32 %v1084_v57, %v3847_v55  ;;  %v1288_v18 = vmul.f32 %v1149_v58, %v3847_v55 }
 0x1cd   :  { %v2979_v59 = vpop.f32.mrf.mxu0  ;;  %v2991_v60 = vpop.f32.mrf.mxu1 }
 0x1ce   :  { %v1294_v10 = vadd.f32 %v1286_v61, %v986_v4  ;;  %v1296_v23 = vadd.f32 %v1288_v18, %v988_v20 }
 0x1cf   :  { %v1087_v63 = vpop.f32.mrf.mxu0  ;;  %v1152_v0 = vpop.f32.mrf.mxu1 }
 0x1d0   :  { %v1287_v6 = vmul.f32 %v1087_v63, %v3861_v1  ;;  %v1289_v12 = vmul.f32 %v1152_v0, %v3861_v1  ;;  %v1606_v63 = vld [vmem:[%s4121_s1] sm:$0xff] }
 0x1d1   :  { %v2980_v7 = vpop.f32.mrf.mxu0  ;;  %v2992_v9 = vpop.f32.mrf.mxu1 }
 0x1d2   :  { %v1295_v11 = vadd.f32 %v1287_v6, %v987_v5  ;;  %v1297_v21 = vadd.f32 %v1289_v12, %v989_v17  ;;  %v1607_v6 = vld [vmem:[%s4121_s1 + $0x8] sm:$0xff] }
 0x1d4   :  { %v1598_v19 = vpack.c.bf16 %v1295_v11, %v1294_v10  ;;  %v1599_v24 = vpack.c.bf16 %v1297_v21, %v1296_v23 }
 0x1d6   :  { %v1613_v22 = vsel %vm1608_vm2, %v1598_v19, 0  ;;  %v1660_v34 = vsel %vm1608_vm2, %v1599_v24, 0 }
 0x1d7   :  { %3066 = vmatpush3.bf16.xpose.msra.mxu0 %v1613_v22 }
 0x1d8   :  { %3071 = vmatprep.subr.bf16.mxu0 %v3339_v8 }
 0x1db   :  { %v1214_v27 = vpop.f32.mrf.mxu0  ;;  %v1279_v28 = vpop.f32.mrf.mxu1 }
 0x1dc   :  { %v1290_v32 = vmul.f32 %v1214_v27, %v3847_v55  ;;  %v1292_v33 = vmul.f32 %v1279_v28, %v3847_v55  ;;  %v993_v55 = vmul.f32 %v982_v52, %v3856_v62 }
 0x1dd   :  { %v3003_v29 = vpop.f32.mrf.mxu0  ;;  %v3015_v31 = vpop.f32.mrf.mxu1 }
 0x1de   :  { %3068 = vmatmul.mubr.msk.bf16.vlgmr.msra.gmra.mxu0 %vm1608_vm2, %v1594_v15  ;;  %v1298_v45 = vadd.f32 %v1290_v32, %v990_v35  ;;  %v1300_v54 = vadd.f32 %v1292_v33, %v992_v40 }
 0x1df   :  { %v1217_v41 = vpop.f32.mrf.mxu0  ;;  %v1282_v42 = vpop.f32.mrf.mxu1  ;;  %3072 = vmatpush3.bf16.xpose.msra.mxu0 %v1660_v34  ;;  %3073 = vmatprep.mubr.msk.bf16.mxu0 %vm3340_vm1, %v3339_v8 }
 0x1e0   :  { %v1291_v2 = vmul.f32 %v1217_v41, %v3861_v1  ;;  %v1293_v13 = vmul.f32 %v1282_v42, %v3861_v1  ;;  %3077 = vmatprep.subr.bf16.mxu0 %v3339_v8 }
 0x1e1   :  { %v3004_v15 = vpop.f32.mrf.mxu0  ;;  %v3016_v44 = vpop.f32.mrf.mxu1 }
 0x1e2   :  { %v1299_v46 = vadd.f32 %v1291_v2, %v991_v43  ;;  %v1301_v47 = vadd.f32 %v1293_v13, %v993_v55 }
 0x1e4   :  { %v1600_v48 = vpack.c.bf16 %v1299_v46, %v1298_v45  ;;  %v1601_v49 = vpack.c.bf16 %v1301_v47, %v1300_v54 }
 0x1e6   :  { %3074 = vmatmul.mubr.msk.bf16.vlgmr.msra.gmra.mxu0 %vm1608_vm2, %v1595_v16  ;;  %v1707_v62 = vsel %vm1608_vm2, %v1600_v48, 0  ;;  %v1754_v50 = vsel %vm1608_vm2, %v1601_v49, 0 }
 0x1e7   :  { %3078 = vmatpush3.bf16.xpose.msra.mxu0 %v1707_v62  ;;  %3084 = vmatpush3.bf16.xpose.msra.mxu1 %v1754_v50 }
 0x1e8   :  { %3079 = vmatprep.mubr.msk.bf16.mxu0 %vm3340_vm1, %v3339_v8  ;;  %3089 = vmatprep.subr.bf16.mxu0 %v3339_v8 }
 0x1e9   :  { %3095 = vmatprep.subr.bf16.mxu1 %v3339_v8 }
 0x1eb   :  { %v1392_v1 = vpop.f32.mrf.mxu0  ;;  %v1457_v51 = vpop.f32.mrf.mxu1 }
 0x1ed   :  { %v3027_v30 = vpop.f32.mrf.mxu0  ;;  %v3039_v52 = vpop.f32.mrf.mxu1 }
 0x1ee   :  { %3080 = vmatmul.mubr.msk.bf16.vlgmr.msra.gmra.mxu0 %vm1608_vm2, %v1596_v38  ;;  %3086 = vmatmul.mubr.msk.bf16.vlgmr.msra.gmra.mxu1 %vm1608_vm2, %v1597_v39 }
 0x1ef   :  { %v1395_v3 = vpop.f32.mrf.mxu0  ;;  %v1460_v14 = vpop.f32.mrf.mxu1  ;;  %3091 = vmatprep.mubr.msk.bf16.mxu0 %vm3340_vm1, %v3339_v8  ;;  %3097 = vmatprep.mubr.msk.bf16.mxu1 %vm3340_vm1, %v3339_v8 }
 0x1f0   :  { %v1602_v16 = vpack.c.bf16 %v1395_v3, %v1392_v1  ;;  %v1603_v53 = vpack.c.bf16 %v1460_v14, %v1457_v51 }
 0x1f1   :  { %v3028_v56 = vpop.f32.mrf.mxu0  ;;  %v3040_v57 = vpop.f32.mrf.mxu1 }
 0x1f2   :  { %3090 = vmatpush3.bf16.msra.mxu0 %v1602_v16  ;;  %3096 = vmatpush3.bf16.msra.mxu1 %v1603_v53 }
 0x1f3   :  { %3101 = vmatprep.subr.bf16.mxu0 %v3339_v8  ;;  %3107 = vmatprep.subr.bf16.mxu1 %v3339_v8 }
 0x1fb   :  { %v3949_v25 = vpop.f32.mrf.mxu0  ;;  %v3951_v26 = vpop.f32.mrf.mxu1 }
 0x1fd   :  { %v3051_v36 = vpop.f32.mrf.mxu0  ;;  %v3063_v37 = vpop.f32.mrf.mxu1 }
 0x1ff   :  { %v3953_v38 = vpop.f32.mrf.mxu0  ;;  %v3955_v39 = vpop.f32.mrf.mxu1 }
 0x200   :  { %v1604_v58 = vpack.c.bf16 %v3953_v38, %v3949_v25  ;;  %v1605_v59 = vpack.c.bf16 %v3955_v39, %v3951_v26  ;;  %v3243_v39 = vld [vmem:[%s4130_s10] sm:$0xff]  }
 0x201   :  { %v3052_v60 = vpop.f32.mrf.mxu0  ;;  %v3064_v61 = vpop.f32.mrf.mxu1 }
 0x29e   :  { %v1649_v0 = vpop.f32.mrf.mxu0 }
 0x29f   :  { %v1650_v4 = vadd.f32 %v1649_v0, %v1606_v63 }
 0x2a0   :  { %v3069_v5 = vpop.f32.mrf.mxu0 }
 0x2a1   :  { %v1797_v7 = vsel %vm1608_vm2, %v1650_v4, -inf }
 0x2a2   :  { %1798 = vmax.xlane.f32.xlu1 %v1797_v7  ;;  %v1652_v9 = vpop.f32.mrf.mxu0 }
 0x2a3   :  { %v1653_v10 = vadd.f32 %v1652_v9, %v1607_v6 }
 0x2a4   :  { %v3070_v11 = vpop.f32.mrf.mxu0 }
 0x2a5   :  { %v1800_v12 = vsel %vm1608_vm2, %v1653_v10, -inf }
 0x2a6   :  { %1801 = vmax.xlane.f32.xlu1 %v1800_v12  ;;  %v1696_v17 = vpop.f32.mrf.mxu0 }
 0x2a7   :  { %v1697_v18 = vadd.f32 %v1696_v17, %v1606_v63 }
 0x2a8   :  { %v3075_v19 = vpop.f32.mrf.mxu0 }
 0x2a9   :  { %v1803_v20 = vsel %vm1608_vm2, %v1697_v18, -inf }
 0x2aa   :  { %1804 = vmax.xlane.f32.xlu0 %v1803_v20  ;;  %v1699_v21 = vpop.f32.mrf.mxu0 }
 0x2ab   :  { %v1700_v22 = vadd.f32 %v1699_v21, %v1607_v6 }
 0x2ac   :  { %v3076_v23 = vpop.f32.mrf.mxu0 }
 0x2ad   :  { %v1806_v24 = vsel %vm1608_vm2, %v1700_v22, -inf }
 0x2ae   :  { %v1790_v27 = vpop.f32.mrf.mxu1  ;;  %1807 = vmax.xlane.f32.xlu1 %v1806_v24  ;;  %v1743_v28 = vpop.f32.mrf.mxu0 }
 0x2af   :  { %v1744_v29 = vadd.f32 %v1743_v28, %v1606_v63  ;;  %v1791_v33 = vadd.f32 %v1790_v27, %v1606_v63 }
 0x2b0   :  { %v3081_v31 = vpop.f32.mrf.mxu0  ;;  %v3087_v32 = vpop.f32.mrf.mxu1 }
 0x2b1   :  { %v1809_v34 = vsel %vm1608_vm2, %v1744_v29, -inf  ;;  %v1815_v2 = vsel %vm1608_vm2, %v1791_v33, -inf }
 0x2b2   :  { %v1793_v35 = vpop.f32.mrf.mxu1  ;;  %1810 = vmax.xlane.f32.xlu0 %v1809_v34  ;;  %v1746_v40 = vpop.f32.mrf.mxu0 }
 0x2b3   :  { %v1747_v41 = vadd.f32 %v1746_v40, %v1607_v6  ;;  %v1794_v55 = vadd.f32 %v1793_v35, %v1607_v6 }
 0x2b4   :  { %v3082_v42 = vpop.f32.mrf.mxu0  ;;  %v3088_v43 = vpop.f32.mrf.mxu1 }
 0x2b5   :  { %v1812_v13 = vsel %vm1608_vm2, %v1747_v41, -inf  ;;  %v1818_v15 = vsel %vm1608_vm2, %v1794_v55, -inf }
 0x2b6   :  { %1816 = vmax.xlane.f32.xlu0 %v1815_v2  ;;  %1813 = vmax.xlane.f32.xlu1 %v1812_v13 }
 0x2ba   :  { %1819 = vmax.xlane.f32.xlu1 %v1818_v15 }
 0x32b   :  { %v1799_v44 = vpop.xlane.xlu1 %1798 }
 0x32c   :  { %v1821_v45 = vsub.f32 %v1650_v4, %v1799_v44 }
 0x32e   :  { %v1829_v54 = vmul.f32 1.442695, %v1821_v45 }
 0x32f   :  { %v1802_v46 = vpop.xlane.xlu1 %1801 }
 0x330   :  { %3271 = vpow2.f32 %v1829_v54  ;;  %v1822_v47 = vsub.f32 %v1653_v10, %v1802_v46 }
 0x332   :  { %v1831_v48 = vmul.f32 1.442695, %v1822_v47 }
 0x333   :  { %v1805_v49 = vpop.xlane.xlu0 %1804 }
 0x334   :  { %3273 = vpow2.f32 %v1831_v48  ;;  %v1823_v62 = vsub.f32 %v1697_v18, %v1805_v49 }
 0x336   :  { %v1833_v50 = vmul.f32 1.442695, %v1823_v62 }
 0x337   :  { %v1808_v1 = vpop.xlane.xlu1 %1807 }
 0x338   :  { %3275 = vpow2.f32 %v1833_v50  ;;  %v1824_v51 = vsub.f32 %v1700_v22, %v1808_v1 }
 0x33a   :  { %v1835_v30 = vmul.f32 1.442695, %v1824_v51  ;;  %v3245_v51 = vld [vmem:[%s4130_s10 + $0x10] sm:$0xff]  }
 0x33b   :  { %v1811_v52 = vpop.xlane.xlu0 %1810 }
 0x33c   :  { %3277 = vpow2.f32 %v1835_v30  ;;  %v1825_v3 = vsub.f32 %v1744_v29, %v1811_v52 }
 0x33d   :  { %v3272_v14 = vpop.eup %3271 }
 0x33e   :  { %v1837_v16 = vmul.f32 1.442695, %v1825_v3  ;;  %v1845_v53 = vsel %vm1608_vm2, %v3272_v14, 0.0 }
 0x33f   :  { %1846 = vadd.xlane.f32.xlu0 %v1845_v53  ;;  %v1817_v56 = vpop.xlane.xlu0 %1816  ;;  %v1814_v57 = vpop.xlane.xlu1 %1813  ;;  %v3246_v53 = vld [vmem:[%s4130_s10 + $0x18] sm:$0xff]  }
 0x340   :  { %3279 = vpow2.f32 %v1837_v16  ;;  %v1827_v36 = vsub.f32 %v1791_v33, %v1817_v56  ;;  %v1826_v37 = vsub.f32 %v1747_v41, %v1814_v57 }
 0x341   :  { %v3274_v60 = vpop.eup %3273 }
 0x342   :  { %v1841_v61 = vmul.f32 1.442695, %v1827_v36  ;;  %v1839_v63 = vmul.f32 1.442695, %v1826_v37  ;;  %v1848_v0 = vsel %vm1608_vm2, %v3274_v60, 0.0 }
 0x343   :  { %1849 = vadd.xlane.f32.xlu1 %v1848_v0  ;;  %v1820_v4 = vpop.xlane.xlu1 %1819 }
 0x344   :  { %3281 = vpow2.f32 %v1841_v61  ;;  %v1828_v5 = vsub.f32 %v1794_v55, %v1820_v4 }
 0x345   :  { %v3276_v6 = vpop.eup %3275  ;;  %3283 = vpow2.f32 %v1839_v63 }
 0x346   :  { %v1843_v7 = vmul.f32 1.442695, %v1828_v5  ;;  %v1851_v9 = vsel %vm1608_vm2, %v3276_v6, 0.0 }
 0x347   :  { %1852 = vadd.xlane.f32.xlu0 %v1851_v9 }
 0x348   :  { %3285 = vpow2.f32 %v1843_v7 }
 0x349   :  { %v3278_v10 = vpop.eup %3277 }
 0x34a   :  { %v1854_v11 = vsel %vm1608_vm2, %v3278_v10, 0.0 }
 0x34b   :  { %1855 = vadd.xlane.f32.xlu1 %v1854_v11 }
 0x34d   :  { %v3280_v12 = vpop.eup %3279 }
 0x34e   :  { %v1857_v17 = vsel %vm1608_vm2, %v3280_v12, 0.0 }
 0x34f   :  { %1858 = vadd.xlane.f32.xlu0 %v1857_v17 }
 0x351   :  { %v3282_v18 = vpop.eup %3281 }
 0x352   :  { %v3284_v19 = vpop.eup %3283  ;;  %v1863_v20 = vsel %vm1608_vm2, %v3282_v18, 0.0 }
 0x353   :  { %1864 = vadd.xlane.f32.xlu0 %v1863_v20  ;;  %v1860_v21 = vsel %vm1608_vm2, %v3284_v19, 0.0 }
 0x354   :  { %1861 = vadd.xlane.f32.xlu1 %v1860_v21 }
 0x355   :  { %v3286_v22 = vpop.eup %3285 }
 0x356   :  { %v1866_v23 = vsel %vm1608_vm2, %v3286_v22, 0.0 }
 0x358   :  { %1867 = vadd.xlane.f32.xlu1 %v1866_v23 }
 0x3c8   :  { %v1847_v24 = vpop.xlane.xlu0 %1846 }
 0x3c9   :  { %3287 = vrcp.f32 %v1847_v24 }
 0x3cc   :  { %v1850_v27 = vpop.xlane.xlu1 %1849 }
 0x3cd   :  { %3289 = vrcp.f32 %v1850_v27 }
 0x3d0   :  { %v1853_v28 = vpop.xlane.xlu0 %1852 }
 0x3d1   :  { %3291 = vrcp.f32 %v1853_v28 }
 0x3d4   :  { %v1856_v29 = vpop.xlane.xlu1 %1855 }
 0x3d5   :  { %3293 = vrcp.f32 %v1856_v29 }
 0x3d6   :  { %v3288_v31 = vpop.eup %3287 }
 0x3d7   :  { %v1877_v34 = vmul.f32 %v3288_v31, %v3272_v14 }
 0x3d8   :  { %v1859_v32 = vpop.xlane.xlu0 %1858 }
 0x3d9   :  { %3295 = vrcp.f32 %v1859_v32 }
 0x3da   :  { %v3290_v33 = vpop.eup %3289 }
 0x3db   :  { %v1878_v35 = vmul.f32 %v3290_v33, %v3274_v60 }
 0x3dc   :  { %v1865_v40 = vpop.xlane.xlu0 %1864 }
 0x3dd   :  { %v1862_v41 = vpop.xlane.xlu1 %1861  ;;  %v1885_v42 = vpack.c.bf16 %v1878_v35, %v1877_v34 }
 0x3de   :  { %3297 = vrcp.f32 %v1862_v41  ;;  %v3292_v43 = vpop.eup %3291 }
 0x3df   :  { %3092 = vmatmul.mubr.msk.bf16.vlgmr.msra.gmra.mxu0 %vm1608_vm2, %v1885_v42  ;;  %3299 = vrcp.f32 %v1865_v40  ;;  %v1879_v13 = vmul.f32 %v3292_v43, %v3276_v6 }
 0x3e0   :  { %3102 = vmatpush3.bf16.msra.mxu0 %v1604_v58  ;;  %3103 = vmatprep.mubr.msk.bf16.mxu0 %vm3340_vm1, %v3339_v8 }
 0x3e1   :  { %v1868_v55 = vpop.xlane.xlu1 %1867  ;;  %3113 = vmatprep.subr.bf16.mxu0 %v3339_v8 }
 0x3e2   :  { %v3294_v2 = vpop.eup %3293  ;;  %3301 = vrcp.f32 %v1868_v55 }
 0x3e3   :  { %v1880_v15 = vmul.f32 %v3294_v2, %v3278_v10 }
 0x3e5   :  { %v1886_v44 = vpack.c.bf16 %v1880_v15, %v1879_v13  ;;  %v3315_v13 = vld [vmem:[%s4120_s0] sm:$0xff] }
 0x3e6   :  { %v3296_v25 = vpop.eup %3295 }
 0x3e7   :  { %3098 = vmatmul.mubr.msk.bf16.vlgmr.msra.gmra.mxu1 %vm1608_vm2, %v1886_v44  ;;  %v1881_v58 = vmul.f32 %v3296_v25, %v3280_v12 }
 0x3e8   :  { %3108 = vmatpush3.bf16.msra.mxu1 %v1605_v59  ;;  %3109 = vmatprep.mubr.msk.bf16.mxu1 %vm3340_vm1, %v3339_v8  ;;  %v3244_v59 = vld [vmem:[%s4130_s10 + $0x8] sm:$0xff]  }
 0x3e9   :  { %3119 = vmatprep.subr.bf16.mxu1 %v3339_v8 }
 0x3eb   :  { %v3298_v38 = vpop.eup %3297 }
 0x3ec   :  { %v1882_v45 = vmul.f32 %v3298_v38, %v3284_v19  ;;  %v3300_v54 = vpop.eup %3299 }
 0x3ed   :  { %v1883_v48 = vmul.f32 %v3300_v54, %v3282_v18  ;;  %v3316_v54 = vld [vmem:[%s4120_s0 + $0x8] sm:$0xff] }
 0x3ee   :  { %v1887_v46 = vpack.c.bf16 %v1882_v45, %v1881_v58 }
 0x3ef   :  { %v3302_v47 = vpop.eup %3301 }
 0x3f0   :  { %3104 = vmatmul.mubr.msk.bf16.vlgmr.msra.gmra.mxu0 %vm1608_vm2, %v1887_v46  ;;  %v1884_v49 = vmul.f32 %v3302_v47, %v3286_v22 }
 0x3f1   :  { %3115 = vmatprep.mubr.msk.bf16.mxu0 %vm3340_vm1, %v3339_v8  ;;  %3114 = vmatpush3.bf16.msra.mxu0 %v3243_v39  ;;  %v3247_v39 = vld [vmem:[%s4132_s12 + $0x30] ss:$8 sps:$4 sm:$0xff]  }
 0x3f2   :  { %v1888_v26 = vpack.c.bf16 %v1884_v49, %v1883_v48  ;;  %3125 = vmatprep.subr.bf16.mxu0 %v3339_v8 }
 0x3f4   :  { %3110 = vmatmul.mubr.msk.bf16.vlgmr.msra.gmra.mxu1 %vm1608_vm2, %v1888_v26  ;;  %v3249_v26 = vld [vmem:[%s4132_s12 + $0x34] ss:$8 sps:$4 sm:$0xff]  }
 0x3f5   :  { %3121 = vmatprep.mubr.msk.bf16.mxu1 %vm3340_vm1, %v3339_v8  ;;  %3120 = vmatpush3.bf16.msra.mxu1 %v3244_v59  ;;  %v3252_v59 = vld [vmem:[%s4132_s12 + $0x24] ss:$8 sps:$4 sm:$0xff]  }
 0x3f6   :  { %3131 = vmatprep.subr.bf16.mxu1 %v3339_v8 }
 0x49f   :  { %v1926_v62 = vpop.f32.mrf.mxu0 }
 0x4a1   :  { %v3093_v50 = vpop.f32.mrf.mxu0 }
 0x4a2   :  { %v3255_v50 = vld [vmem:[%s4132_s12 + $0x14] ss:$8 sps:$4 sm:$0xff]  }
 0x4a3   :  { %v1929_v1 = vpop.f32.mrf.mxu0 }
 0x4a4   :  { %v2065_v30 = vpack.c.bf16 %v1929_v1, %v1926_v62  ;;  %v3250_v62 = vld [vmem:[%s4132_s12 + $0x20] ss:$8 sps:$4 sm:$0xff]   ;;  %v3253_v1 = vld [vmem:[%s4132_s12 + $0x10] ss:$8 sps:$4 sm:$0xff]  }
 0x4a5   :  { %v3094_v52 = vpop.f32.mrf.mxu0 }
 0x4a6   :  { %3116 = vmatmul.mubr.msk.bf16.vlgmr.msra.gmra.mxu0 %vm1608_vm2, %v2065_v30  ;;  %v3258_v30 = vld [vmem:[%s4132_s12 + $0x4] ss:$8 sps:$4 sm:$0xff]   ;;  %v3341_v52 = vmov 0  }
 0x4a7   :  { %v1970_v3 = vpop.f32.mrf.mxu1  ;;  %3126 = vmatpush3.bf16.msra.mxu0 %v3245_v51  ;;  %3127 = vmatprep.mubr.msk.bf16.mxu0 %vm3340_vm1, %v3339_v8  ;;  %v3256_v51 = vld [vmem:[%s4132_s12] ss:$8 sps:$4 sm:$0xff]  }
 0x4a8   :  { %2378 = vmatprep.subr.bf16.mxu0 %v3249_v26 }
 0x4a9   :  { %v3099_v14 = vpop.f32.mrf.mxu1 }
 0x4ab   :  { %v1973_v16 = vpop.f32.mrf.mxu1 }
 0x4ac   :  { %v2066_v56 = vpack.c.bf16 %v1973_v16, %v1970_v3 }
 0x4ad   :  { %v3100_v57 = vpop.f32.mrf.mxu1 }
 0x4ae   :  { %3122 = vmatmul.mubr.msk.bf16.vlgmr.msra.gmra.mxu1 %vm1608_vm2, %v2066_v56 }
 0x4af   :  { %3132 = vmatpush3.bf16.msra.mxu1 %v3246_v53  ;;  %3133 = vmatprep.mubr.msk.bf16.mxu1 %vm3340_vm1, %v3339_v8 }
 0x4b0   :  { %v2014_v36 = vpop.f32.mrf.mxu0  ;;  %3137 = vmatprep.subr.bf16.mxu1 %v3339_v8 }
 0x4b2   :  { %v3105_v37 = vpop.f32.mrf.mxu0 }
 0x4b4   :  { %v2017_v60 = vpop.f32.mrf.mxu0  ;;  %v2058_v61 = vpop.f32.mrf.mxu1 }
 0x4b5   :  { %v2067_v63 = vpack.c.bf16 %v2017_v60, %v2014_v36 }
 0x4b6   :  { %v3106_v0 = vpop.f32.mrf.mxu0  ;;  %v3111_v4 = vpop.f32.mrf.mxu1 }
 0x4b7   :  { %3128 = vmatmul.mubr.msk.bf16.vlgmr.msra.gmra.mxu0 %vm1608_vm2, %v2067_v63 }
 0x4b8   :  { %v2061_v5 = vpop.f32.mrf.mxu1  ;;  %2379 = vmatpush1.bf16.msra.mxu0 %v3247_v39  ;;  %2402 = vmatprep.mubr.bf16.mxu0 %v3341_v52 }
 0x4b9   :  { %v2068_v6 = vpack.c.bf16 %v2061_v5, %v2058_v61  ;;  %2380 = vmatprep.subr.bf16.mxu0 %v3252_v59  ;;  %v2672_v61 = vld [vmem:[%s4131_s11] ss:$0 sm:$0xff] }
 0x4ba   :  { %v3112_v7 = vpop.f32.mrf.mxu1 }
 0x4bb   :  { %3134 = vmatmul.mubr.msk.bf16.vlgmr.msra.gmra.mxu1 %vm1608_vm2, %v2068_v6  ;;  %v3259_v6 = vld [vmem:[%s4133_s13 + $0x38] sm:$0xff]   ;;  %v3260_v7 = vld [vmem:[%s4133_s13 + $0x30] sm:$0xff]  }
 0x4bc   :  { %3153 = vmatprep.mubr.msk.bf16.mxu1 %vm3340_vm1, %v3339_v8  ;;  %2381 = vmatpush1.bf16.msra.mxu0 %v3250_v62 }
 0x4bd   :  { %2382 = vmatprep.subr.bf16.mxu0 %v3255_v50  ;;  %3138 = vmatpush3.bf16.msra.mxu1 %v3259_v6 }
 0x4be   :  { %3139 = vmatprep.subr.bf16.mxu1 %v3339_v8 }
 0x4c0   :  { %2383 = vmatpush1.bf16.msra.mxu0 %v3253_v1 }
 0x4c1   :  { %2384 = vmatprep.subr.bf16.mxu0 %v3258_v30  ;;  %3140 = vmatpush3.bf16.msra.mxu1 %v3260_v7 }
 0x4c2   :  { %3141 = vmatprep.subr.bf16.mxu1 %v3339_v8 }
 0x4c4   :  { %2385 = vmatpush1.bf16.msra.mxu0 %v3256_v51 }
 0x566   :  { %v2120_v9 = vpop.f32.mrf.mxu0 }
 0x567   :  { %v2277_v23 = vsel %vm54_vm0, %v2120_v9, 0.0  ;;  %v3261_v9 = vld [vmem:[%s4133_s13 + $0x28] sm:$0xff]  }
 0x568   :  { %v3117_v10 = vpop.f32.mrf.mxu0  ;;  %3142 = vmatpush3.bf16.msra.mxu1 %v3261_v9 }
 0x569   :  { %3143 = vmatprep.subr.bf16.mxu1 %v3339_v8  ;;  %v3262_v10 = vld [vmem:[%s4133_s13 + $0x20] sm:$0xff]  }
 0x56a   :  { %v2123_v11 = vpop.f32.mrf.mxu0 }
 0x56b   :  { %v2284_v34 = vsel %vm54_vm0, %v2123_v11, 0.0  ;;  %v3263_v11 = vld [vmem:[%s4133_s13 + $0x18] sm:$0xff]  }
 0x56c   :  { %v3118_v12 = vpop.f32.mrf.mxu0  ;;  %3144 = vmatpush3.bf16.msra.mxu1 %v3262_v10 }
 0x56d   :  { %3145 = vmatprep.subr.bf16.mxu1 %v3339_v8  ;;  %v3264_v12 = vld [vmem:[%s4133_s13 + $0x10] sm:$0xff]  }
 0x56e   :  { %v2170_v17 = vpop.f32.mrf.mxu1 }
 0x56f   :  { %v2278_v21 = vsel %vm54_vm0, %v2170_v17, 0.0  ;;  %v3265_v17 = vld [vmem:[%s4133_s13 + $0x8] sm:$0xff]  }
 0x570   :  { %v3123_v18 = vpop.f32.mrf.mxu1  ;;  %v2279_v27 = vadd.f32 %v2278_v21, %v2277_v23  ;;  %3146 = vmatpush3.bf16.msra.mxu1 %v3263_v11 }
 0x571   :  { %3147 = vmatprep.subr.bf16.mxu1 %v3339_v8  ;;  %v3266_v18 = vld [vmem:[%s4133_s13] sm:$0xff]   ;;  %s3342_s13 = smov [#allocation2]  }
 0x572   :  { %v2173_v19 = vpop.f32.mrf.mxu1  ;;  %s2544_s27 = sshll.u32 %s3342_s13, 4  ;;  %s2545_s27 = int_to_ptr.vmem [resolvable:$true] %s2544_s27 }
 0x573   :  { %v2285_v29 = vsel %vm54_vm0, %v2173_v19, 0.0  ;;  %s3317_s7 = scalar_lea.vmem %s2545_s27, 256  ;;  %p3322_p1 = scmp.lt.s32.totalorder %s2545_s27, %s2545_s27 }
 0x574   :  { %v3124_v20 = vpop.f32.mrf.mxu1  ;;  %v2286_v41 = vadd.f32 %v2285_v29, %v2284_v34  ;;  %3148 = vmatpush3.bf16.msra.mxu1 %v3264_v12  ;;  %p3318_p0 = scmp.ne.s32.totalorder %s2545_s27, %s3317_s7  ;;  %p3323_p2 = scmp.lt.s32.totalorder %s3317_s7, %s3317_s7 }
 0x575   :  { %3149 = vmatprep.subr.bf16.mxu1 %v3339_v8 }
 0x576   :  { %p3324_p3 = por %p3323_p2, %p3322_p1 }
 0x577   :  { %v2220_v22 = vpop.f32.mrf.mxu0 }
 0x578   :  { %v2280_v24 = vsel %vm54_vm0, %v2220_v22, 0.0  ;;  %3150 = vmatpush3.bf16.msra.mxu1 %v3265_v17  ;;  %p3325_p4 = pnand %p3324_p3, %p3318_p0 }
 0x579   :  { %v3129_v28 = vpop.f32.mrf.mxu0  ;;  %v2281_v31 = vadd.f32 %v2280_v24, %v2279_v27  ;;  %3151 = vmatprep.subr.bf16.mxu1 %v3339_v8 }
 0x57b   :  { %v2223_v32 = vpop.f32.mrf.mxu0  ;;  %v2270_v33 = vpop.f32.mrf.mxu1 }
 0x57c   :  { %v2287_v35 = vsel %vm54_vm0, %v2223_v32, 0.0  ;;  %v2282_v40 = vsel %vm54_vm0, %v2270_v33, 0.0  ;;  %3152 = vmatpush3.bf16.msra.mxu1 %v3266_v18 }
 0x57d   :  { %v2283_v42 = vadd.f32 %v2282_v40, %v2281_v31  ;;  %v3130_v43 = vpop.f32.mrf.mxu0  ;;  %v3135_v55 = vpop.f32.mrf.mxu1  ;;  %v2288_v2 = vadd.f32 %v2287_v35, %v2286_v41 }
 0x57f   :  { %v4038_v15 = vadd.f32 %v3315_v13, %v2283_v42  ;;  %v2273_v44 = vpop.f32.mrf.mxu1 }
 0x580   :  { %v2289_v25 = vsel %vm54_vm0, %v2273_v44, 0.0 }
 0x581   :  { %v2290_v38 = vadd.f32 %v2289_v25, %v2288_v2  ;;  %v3136_v58 = vpop.f32.mrf.mxu1  ;;  %v2294_v45 = vmul.f32 %v4038_v15, %v4038_v15 }
 0x583   :  { %v4046_v46 = vadd.f32 %v3316_v54, %v2290_v38  ;;  %v2296_v47 = vsel %vm54_vm0, %v2294_v45, 0.0 }
 0x584   :  { %2297 = vadd.xlane.f32.xlu0 %v2296_v47 }
 0x585   :  { %v2295_v48 = vmul.f32 %v4046_v46, %v4046_v46 }
 0x587   :  { %v2299_v49 = vsel %vm54_vm0, %v2295_v48, 0.0 }
 0x588   :  { %2300 = vadd.xlane.f32.xlu1 %v2299_v49 }
 0x60d   :  { %v2298_v3 = vpop.xlane.xlu0 %2297 }
 0x60e   :  { %v2302_v14 = vmul.f32 0.015625, %v2298_v3 }
 0x610   :  { %v2304_v16 = vadd.f32 1e-05, %v2302_v14 }
 0x611   :  { %v2301_v53 = vpop.xlane.xlu1 %2300 }
 0x612   :  { %3303 = vrsqrt.f32 %v2304_v16  ;;  %v2303_v56 = vmul.f32 0.015625, %v2301_v53 }
 0x614   :  { %v2305_v57 = vadd.f32 1e-05, %v2303_v56 }
 0x616   :  { %3305 = vrsqrt.f32 %v2305_v57 }
 0x61f   :  { %v3304_v36 = vpop.eup %3303 }
 0x620   :  { %v2308_v37 = vmul.f32 %v3304_v36, %v4038_v15 }
 0x622   :  { %v2316_v0 = vmul.f32 %v2672_v61, %v2308_v37 }
 0x623   :  { %v3306_v60 = vpop.eup %3305 }
 0x624   :  { %v2309_v63 = vmul.f32 %v3306_v60, %v4046_v46 }
 0x626   :  { %v2317_v4 = vmul.f32 %v2672_v61, %v2309_v63 }
 0x628   :  { %v2318_v5 = vpack.c.bf16 %v2317_v4, %v2316_v0 }
 0x62a   :  { %2681 = vmatmul.mubr.msk.bf16.vlgmr.msra.gmra.mxu0 %vm54_vm0, %v2318_v5 }
 0x6ea   :  { %v2404_v19 = vpop.f32.mrf.mxu0 }
 0x6eb   :  { %v2682_v20 = vmul.f32 -1.442695, %v2404_v19 }
 0x6ec   :  { %v2406_v21 = vpop.f32.mrf.mxu0 }
 0x6ed   :  { %3307 = vpow2.f32 %v2682_v20 }
 0x6ee   :  { %v2408_v22 = vpop.f32.mrf.mxu0 }
 0x6ef   :  { %v2683_v23 = vmul.f32 -1.442695, %v2408_v22 }
 0x6f0   :  { %v2410_v34 = vpop.f32.mrf.mxu0 }
 0x6f1   :  { %3309 = vpow2.f32 %v2683_v23 }
 0x6fa   :  { %v3308_v24 = vpop.eup %3307 }
 0x6fb   :  { %v2419_v27 = vadd.f32 1.0, %v3308_v24 }
 0x6fd   :  { %3311 = vrcp.f32 %v2419_v27 }
 0x6fe   :  { %v3310_v28 = vpop.eup %3309 }
 0x6ff   :  { %v2420_v29 = vadd.f32 1.0, %v3310_v28 }
 0x701   :  { %3313 = vrcp.f32 %v2420_v29 }
 0x70a   :  { %v3312_v31 = vpop.eup %3311 }
 0x70b   :  { %v2425_v8 = vmul.f32 %v3312_v31, %v2404_v19 }
 0x70d   :  { %v2427_v35 = vmul.f32 %v2425_v8, %v2406_v21 }
 0x70e   :  { %v3314_v32 = vpop.eup %3313 }
 0x70f   :  { %v2426_v33 = vmul.f32 %v3314_v32, %v2408_v22 }
 0x711   :  { %v2428_v40 = vmul.f32 %v2426_v33, %v2410_v34 }
 0x713   :  { %v2429_v41 = vpack.c.bf16 %v2428_v40, %v2427_v35 }
 0x715   :  { %3154 = vmatmul.mubr.bf16.vlgmr.msra.gmra.mxu1 %v2429_v41 }
 0x7d5   :  { %v2528_v42 = vpop.f32.mrf.mxu1 }
 0x7d6   :  { %v2535_v43 = vadd.f32 %v2528_v42, %v4038_v15 }
 0x7d7   :  { %v3155_v55 = vpop.f32.mrf.mxu1 }
 0x7d8   :  { %2537 = vst.msk [vmem:[#allocation2] sm:$0xff] %vm54_vm0, %v2535_v43 }
 0x7d9   :  { %v2531_v2 = vpop.f32.mrf.mxu1 }
 0x7da   :  { %v2536_v13 = vadd.f32 %v2531_v2, %v4046_v46 }
 0x7db   :  { %v3156_v44 = vpop.f32.mrf.mxu1 }
 0x7dc   :  { %2538 = vst.msk [vmem:[#allocation2 + $0x8] sm:$0xff] %vm54_vm0, %v2536_v13 }
 0x7dd   :  { %3328 = shalt.err (!%p3325_p4)
}
 0x7de   :  { %s3343_s28 = smov 128   ;;  %s3344_s29 = smov 8  }
 0x7df   :  { %2550 = dma.vmem_to_hbm [thread:$0]  %s2545_s27, 256, %s4134_s14, [#allocation3], %s3343_s28, %s3343_s28, %s3344_s29  }
 0x7e0   :  { %3337 = dma.done.wait [#allocation3], 256  }
 0x7e1   :  { %3338 = vsyncadd [#allocation3], 4294967040 }
 0x7e2   :  { %2554 = vsyncpa [#allocation3], 1 }

</bundles_post_ra>
